<compile_context>
chip_gen: v7x
topology: tpu7x:2x2x1
jax: 0.10.0
libtpu: 0.0.40
codegen_flags: <defaults>
</compile_context>

<pallas_src>
import functools

import jax
import jax.numpy as jnp
import numpy as np
from jax.experimental import pallas as pl
from jax.experimental.pallas import tpu as pltpu


def _sa_kernel(wp, mm_dtype, p1_ref, valid_ref, w2_ref, b2_ref, x_ref, o_ref):
    """One (image, row-block) slab per grid step.

    p1_ref    : SMEM (12,)            [w1a/C, b1a, b1b, w1b[0..8]]
    valid_ref : VMEM (1, 1, L)        1.0 at in-image pixels of the slab, else 0
    w2_ref    : VMEM (Cout, 9*C)      conv_part2 weights, tap-major (bf16/f32)
    b2_ref    : VMEM (Cout, 1)        conv_part2 bias (f32)
    x_ref     : VMEM (1, 1, C, L)     slab = (rblk+4) rows x Wp cols, flattened
    o_ref     : VMEM (1, 1, Cout, Lo) Lo = rblk*Wp (central rows only)
    """
    x = x_ref[0, 0]                       # (C, L) f32
    valid = valid_ref[0]                  # (1, L) f32
    L = x.shape[1]
    lo = o_ref.shape[3]

    # ---- conv_part1: mean over C (MXU matmul) -> 1x1 conv -> ReLU ------------
    #   y = relu(sum_c(x) * (w1a/C) + b1a), zeroed outside the image so the
    #   3x3 conv below sees true zero padding.
    ones_c = jnp.ones((1, x.shape[0]), jnp.float32)
    y = jnp.dot(ones_c, x, preferred_element_type=jnp.float32)        # (1, L)
    y = jnp.maximum(y * p1_ref[0] + p1_ref[1], 0.0) * valid

    # ---- conv_part1: 3x3 (1->1 channel) via 9 lane rolls of the tiny plane ---
    # Row offsets are +-wp in the flattened slab; column wrap-around always
    # lands in a zero pad column, so no per-tap masks are needed.
    acc1 = jnp.zeros_like(y)
    t = 0
    for dr in (-1, 0, 1):
        for dc in (-1, 0, 1):
            off = dr * wp + dc
            sh = pltpu.roll(y, shift=(-off) % L, axis=1) if off != 0 else y
            acc1 = acc1 + p1_ref[3 + t] * sh
            t += 1
    att = jax.nn.sigmoid(acc1 + p1_ref[2]) * valid                    # (1, L)

    # x = x_part1 + x  (attention broadcast over channels); att is zeroed at
    # pad columns / out-of-image halo rows so x2 provides conv zero padding.
    x2f = att + x                                                     # (C, L) f32

    # ---- conv_part2: ONE fused K=9C MXU matmul -------------------------------
    # 2 column rolls + 9 lane-aligned row-offset slices build the stacked RHS.
    x2c = x2f.astype(mm_dtype)
    x2l = pltpu.roll(x2f, shift=1, axis=1).astype(mm_dtype)           # col j-1
    x2r = pltpu.roll(x2f, shift=L - 1, axis=1).astype(mm_dtype)       # col j+1
    planes = []
    for dr in (-1, 0, 1):
        r0 = (2 + dr) * wp                     # central rows start at slab row 2
        for src in (x2l, x2c, x2r):            # dc = -1, 0, +1  (tap-major order)
            planes.append(src[:, r0:r0 + lo])
    rhs = jnp.concatenate(planes, axis=0)                              # (9C, Lo)

    acc2 = jnp.dot(w2_ref[...], rhs, preferred_element_type=jnp.float32)
    o_ref[0, 0] = jax.nn.sigmoid(acc2 + b2_ref[...])                   # (Cout, Lo)


def spatial_attention(x, params, *, rblk=8, use_bf16=True):
    """Pallas forward of SpatialAttention.  x: (N, C, H, W) f32."""
    N, C, H, W = x.shape
    w2 = params["w2"]
    Cout = w2.shape[0]

    # Lane padding: at least one zero column so +-1 column rolls wrap into zeros.
    Wp = ((W + 1 + 127) // 128) * 128
    RB = pl.cdiv(H, rblk)
    Hp = RB * rblk
    Rr = rblk + 4                      # 2 halo rows each side (double 3x3 halo)
    L = Rr * Wp
    Lo = rblk * Wp
    mm_dtype = jnp.bfloat16 if use_bf16 else jnp.float32

    # ---- build halo'd, zero-padded, lane-dense row-block slabs ---------------
    xf = x.astype(jnp.float32)
    xp = jnp.pad(xf, ((0, 0), (0, 0), (2, Hp - H + 2), (0, Wp - W)))
    idx = np.arange(RB)[:, None] * rblk + np.arange(Rr)[None, :]       # (RB, Rr)
    xb = xp[:, :, idx, :]                                              # (N, C, RB, Rr, Wp)
    xb = jnp.transpose(xb, (0, 2, 1, 3, 4)).reshape(N, RB, C, L)

    # per-block in-image validity plane (rows/cols); shared column mask.
    orig_rows = idx - 2
    row_ok = (orig_rows >= 0) & (orig_rows < H)                         # (RB, Rr)
    col_ok = np.arange(Wp) < W                                          # (Wp,)
    valid_np = (row_ok[:, :, None] & col_ok[None, None, :]).astype(np.float32)
    valid = jnp.asarray(valid_np.reshape(RB, 1, L))

    # conv_part1 scalars (SMEM): [w1a/C, b1a, b1b, w1b row-major]
    p1 = jnp.concatenate([
        params["w1a"].reshape(1) / C,
        params["b1a"].reshape(1),
        params["b1b"].reshape(1),
        params["w1b"].reshape(9),
    ]).astype(jnp.float32)

    # conv_part2 weights fused tap-major: w2f[o, (kh*3+kw)*C + c] = w2[o, c, kh, kw]
    w2f = jnp.transpose(w2, (0, 2, 3, 1)).reshape(Cout, 9 * C).astype(mm_dtype)
    b2 = params["b2"].reshape(Cout, 1).astype(jnp.float32)

    kernel = functools.partial(_sa_kernel, Wp, mm_dtype)
    smem = pl.BlockSpec(memory_space=pltpu.MemorySpace.SMEM)
    out = pl.pallas_call(
        kernel,
        out_shape=jax.ShapeDtypeStruct((N, RB, Cout, Lo), jnp.float32),
        grid=(N, RB),
        in_specs=[
            smem,                                                   # p1 scalars
            pl.BlockSpec((1, 1, L), lambda n, rb: (rb, 0, 0)),      # valid plane
            pl.BlockSpec((Cout, 9 * C), lambda n, rb: (0, 0)),      # fused w2
            pl.BlockSpec((Cout, 1), lambda n, rb: (0, 0)),          # b2
            # x slabs; at prod sizes consider pipeline_mode=pl.Buffered(3) on v5e
            pl.BlockSpec((1, 1, C, L), lambda n, rb: (n, rb, 0, 0)),
        ],
        out_specs=pl.BlockSpec((1, 1, Cout, Lo), lambda n, rb: (n, rb, 0, 0)),
        compiler_params=pltpu.CompilerParams(
            dimension_semantics=("parallel", "parallel"),
            vmem_limit_bytes=32 * 1024 * 1024),
    )(p1, valid, w2f, b2, xb)

    out = out.reshape(N, RB, Cout, rblk, Wp)
    out = jnp.transpose(out, (0, 2, 1, 3, 4)).reshape(N, Cout, Hp, Wp)
    return out[:, :, :H, :W]


# ---------------- pure-JAX reference (for correctness check) ----------------

def _conv2d(x, w, b, padding):
    out = jax.lax.conv_general_dilated(
        x, w, window_strides=(1, 1), padding=padding,
        dimension_numbers=("NCHW", "OIHW", "NCHW"))
    return out + b.reshape(1, -1, 1, 1)


def spatial_attention_ref(x, p):
    x1 = jnp.mean(x, axis=1, keepdims=True)
    x1 = jax.nn.relu(_conv2d(x1, p["w1a"], p["b1a"], "VALID"))
    x1 = jax.nn.sigmoid(_conv2d(x1, p["w1b"], p["b1b"], [(1, 1), (1, 1)]))
    xs = x1 + x
    return jax.nn.sigmoid(_conv2d(xs, p["w2"], p["b2"], [(1, 1), (1, 1)]))


def init_params(key, cin=4, cout=4):
    ks = jax.random.split(key, 6)
    return {
        # conv_part1: Conv2d(1,1,1,1,0) -> ReLU -> Conv2d(1,1,3,1,1) -> Sigmoid
        "w1a": 0.5 * jax.random.normal(ks[0], (1, 1, 1, 1), jnp.float32),
        "b1a": 0.1 * jax.random.normal(ks[1], (1,), jnp.float32),
        "w1b": 0.3 * jax.random.normal(ks[2], (1, 1, 3, 3), jnp.float32),
        "b1b": 0.1 * jax.random.normal(ks[3], (1,), jnp.float32),
        # conv_part2: Conv2d(cin, cout, 3, 1, 1) -> Sigmoid
        "w2": 0.3 * jax.random.normal(ks[4], (cout, cin, 3, 3), jnp.float32),
        "b2": 0.1 * jax.random.normal(ks[5], (cout,), jnp.float32),
    }


if __name__ == "__main__":
    key = jax.random.PRNGKey(0)
    kx, kp = jax.random.split(key)

    N, C, H, W = 2, 4, 16, 16
    x = jax.random.normal(kx, (N, C, H, W), jnp.float32)
    params = init_params(kp, cin=C, cout=C)

    ref = spatial_attention_ref(x, params)

    # Structure check: f32 MXU operands, tight tolerance.
    out_f32 = jax.block_until_ready(spatial_attention(x, params, rblk=8, use_bf16=False))
    assert out_f32.shape == (N, C, H, W)
    np.testing.assert_allclose(np.asarray(out_f32), np.asarray(ref), rtol=1e-4, atol=1e-4)

    # Production path: bf16 conv_part2 operands (2-4x MXU rate on v6e/v7x),
    # f32 accumulation; bf16 rounding needs a looser tolerance.
    out_bf16 = jax.block_until_ready(spatial_attention(x, params, rblk=8, use_bf16=True))
    assert out_bf16.shape == (N, C, H, W)
    np.testing.assert_allclose(np.asarray(out_bf16), np.asarray(ref), rtol=2.5e-2, atol=2.5e-2)

    print("KERNEL_OK")
</pallas_src>

<mosaic_0001>
module attributes {stable_mosaic.version = 11 : i64} {
  func.func @_sa_kernel(%arg0: i32, %arg1: i32, %arg2: memref<12xf32, #tpu.memory_space<smem>>, %arg3: memref<1x1x1536xf32, #tpu.memory_space<vmem>>, %arg4: memref<4x36xf32, #tpu.memory_space<vmem>>, %arg5: memref<4x1xf32, #tpu.memory_space<vmem>>, %arg6: memref<1x1x4x1536xf32, #tpu.memory_space<vmem>>, %arg7: memref<1x1x4x1024xf32, #tpu.memory_space<vmem>>) attributes {dimension_semantics = [#tpu.dimension_semantics<parallel>, #tpu.dimension_semantics<parallel>], iteration_bounds = array<i64: 2, 2>, scalar_prefetch = 0 : i64, scratch_operands = 0 : i64, tpu.core_type = #tpu.core_type<tc>, window_params = [{transform_indices = @transform_0, window_bounds = array<i64: 12>}, {transform_indices = @transform_1, window_bounds = array<i64: 1, 1, 1536>}, {pipeline_mode = #tpu.pipeline_mode<synchronous>, transform_indices = @transform_2, window_bounds = array<i64: 4, 36>}, {pipeline_mode = #tpu.pipeline_mode<synchronous>, transform_indices = @transform_3, window_bounds = array<i64: 4, 1>}, {transform_indices = @transform_4, window_bounds = array<i64: 1, 1, 4, 1536>}, {transform_indices = @transform_5, window_bounds = array<i64: 1, 1, 4, 1024>}]} {
    %c0 = arith.constant 0 : index
    %c0_0 = arith.constant 0 : index
    %c0_1 = arith.constant 0 : index
    %c0_2 = arith.constant 0 : index
    %0 = vector.load %arg6[%c0, %c0_0, %c0_1, %c0_2] : memref<1x1x4x1536xf32, #tpu.memory_space<vmem>>, vector<1x1x4x1536xf32>
    %1 = vector.shape_cast %0 : vector<1x1x4x1536xf32> to vector<4x1536xf32>
    %c0_3 = arith.constant 0 : index
    %c0_4 = arith.constant 0 : index
    %c0_5 = arith.constant 0 : index
    %2 = vector.load %arg3[%c0_3, %c0_4, %c0_5] : memref<1x1x1536xf32, #tpu.memory_space<vmem>>, vector<1x1x1536xf32>
    %3 = vector.shape_cast %2 : vector<1x1x1536xf32> to vector<1x1536xf32>
    %cst = arith.constant 1.000000e+00 : f32
    %4 = vector.broadcast %cst : f32 to vector<1x4xf32>
    %cst_6 = arith.constant dense<0.000000e+00> : vector<1x1536xf32>
    %5 = tpu.matmul %4, %1, %cst_6 {dimension_numbers = #tpu.dot_dimension_numbers<[1], [0], [0], [1], [0, 0, 1, 1], [], []>} : vector<1x4xf32>, vector<4x1536xf32>, vector<1x1536xf32> -> vector<1x1536xf32>
    %c0_7 = arith.constant 0 : index
    %6 = memref.load %arg2[%c0_7] : memref<12xf32, #tpu.memory_space<smem>>
    %7 = vector.broadcast %6 : f32 to vector<1x1536xf32>
    %8 = arith.mulf %5, %7 : vector<1x1536xf32>
    %c1 = arith.constant 1 : index
    %9 = memref.load %arg2[%c1] : memref<12xf32, #tpu.memory_space<smem>>
    %10 = vector.broadcast %9 : f32 to vector<1x1536xf32>
    %11 = arith.addf %8, %10 : vector<1x1536xf32>
    %cst_8 = arith.constant 0.000000e+00 : f32
    %12 = vector.broadcast %cst_8 : f32 to vector<1x1536xf32>
    %13 = arith.maximumf %11, %12 : vector<1x1536xf32>
    %14 = arith.mulf %13, %3 : vector<1x1536xf32>
    %cst_9 = arith.constant 0.000000e+00 : f32
    %15 = vector.broadcast %cst_9 : f32 to vector<1x1536xf32>
    %c129_i32 = arith.constant 129 : i32
    %16 = tpu.dynamic_rotate %14 by %c129_i32 dim 1 : vector<1x1536xf32>, i32 -> vector<1x1536xf32>
    %c3 = arith.constant 3 : index
    %17 = memref.load %arg2[%c3] : memref<12xf32, #tpu.memory_space<smem>>
    %18 = vector.broadcast %17 : f32 to vector<1x1536xf32>
    %19 = arith.mulf %18, %16 : vector<1x1536xf32>
    %20 = arith.addf %15, %19 : vector<1x1536xf32>
    %c128_i32 = arith.constant 128 : i32
    %21 = tpu.dynamic_rotate %14 by %c128_i32 dim 1 : vector<1x1536xf32>, i32 -> vector<1x1536xf32>
    %c4 = arith.constant 4 : index
    %22 = memref.load %arg2[%c4] : memref<12xf32, #tpu.memory_space<smem>>
    %23 = vector.broadcast %22 : f32 to vector<1x1536xf32>
    %24 = arith.mulf %23, %21 : vector<1x1536xf32>
    %25 = arith.addf %20, %24 : vector<1x1536xf32>
    %c127_i32 = arith.constant 127 : i32
    %26 = tpu.dynamic_rotate %14 by %c127_i32 dim 1 : vector<1x1536xf32>, i32 -> vector<1x1536xf32>
    %c5 = arith.constant 5 : index
    %27 = memref.load %arg2[%c5] : memref<12xf32, #tpu.memory_space<smem>>
    %28 = vector.broadcast %27 : f32 to vector<1x1536xf32>
    %29 = arith.mulf %28, %26 : vector<1x1536xf32>
    %30 = arith.addf %25, %29 : vector<1x1536xf32>
    %c1_i32 = arith.constant 1 : i32
    %31 = tpu.dynamic_rotate %14 by %c1_i32 dim 1 : vector<1x1536xf32>, i32 -> vector<1x1536xf32>
    %c6 = arith.constant 6 : index
    %32 = memref.load %arg2[%c6] : memref<12xf32, #tpu.memory_space<smem>>
    %33 = vector.broadcast %32 : f32 to vector<1x1536xf32>
    %34 = arith.mulf %33, %31 : vector<1x1536xf32>
    %35 = arith.addf %30, %34 : vector<1x1536xf32>
    %c7 = arith.constant 7 : index
    %36 = memref.load %arg2[%c7] : memref<12xf32, #tpu.memory_space<smem>>
    %37 = vector.broadcast %36 : f32 to vector<1x1536xf32>
    %38 = arith.mulf %37, %14 : vector<1x1536xf32>
    %39 = arith.addf %35, %38 : vector<1x1536xf32>
    %c1535_i32 = arith.constant 1535 : i32
    %40 = tpu.dynamic_rotate %14 by %c1535_i32 dim 1 : vector<1x1536xf32>, i32 -> vector<1x1536xf32>
    %c8 = arith.constant 8 : index
    %41 = memref.load %arg2[%c8] : memref<12xf32, #tpu.memory_space<smem>>
    %42 = vector.broadcast %41 : f32 to vector<1x1536xf32>
    %43 = arith.mulf %42, %40 : vector<1x1536xf32>
    %44 = arith.addf %39, %43 : vector<1x1536xf32>
    %c1409_i32 = arith.constant 1409 : i32
    %45 = tpu.dynamic_rotate %14 by %c1409_i32 dim 1 : vector<1x1536xf32>, i32 -> vector<1x1536xf32>
    %c9 = arith.constant 9 : index
    %46 = memref.load %arg2[%c9] : memref<12xf32, #tpu.memory_space<smem>>
    %47 = vector.broadcast %46 : f32 to vector<1x1536xf32>
    %48 = arith.mulf %47, %45 : vector<1x1536xf32>
    %49 = arith.addf %44, %48 : vector<1x1536xf32>
    %c1408_i32 = arith.constant 1408 : i32
    %50 = tpu.dynamic_rotate %14 by %c1408_i32 dim 1 : vector<1x1536xf32>, i32 -> vector<1x1536xf32>
    %c10 = arith.constant 10 : index
    %51 = memref.load %arg2[%c10] : memref<12xf32, #tpu.memory_space<smem>>
    %52 = vector.broadcast %51 : f32 to vector<1x1536xf32>
    %53 = arith.mulf %52, %50 : vector<1x1536xf32>
    %54 = arith.addf %49, %53 : vector<1x1536xf32>
    %c1407_i32 = arith.constant 1407 : i32
    %55 = tpu.dynamic_rotate %14 by %c1407_i32 dim 1 : vector<1x1536xf32>, i32 -> vector<1x1536xf32>
    %c11 = arith.constant 11 : index
    %56 = memref.load %arg2[%c11] : memref<12xf32, #tpu.memory_space<smem>>
    %57 = vector.broadcast %56 : f32 to vector<1x1536xf32>
    %58 = arith.mulf %57, %55 : vector<1x1536xf32>
    %59 = arith.addf %54, %58 : vector<1x1536xf32>
    %c2 = arith.constant 2 : index
    %60 = memref.load %arg2[%c2] : memref<12xf32, #tpu.memory_space<smem>>
    %61 = vector.broadcast %60 : f32 to vector<1x1536xf32>
    %62 = arith.addf %59, %61 : vector<1x1536xf32>
    %63 = arith.negf %62 : vector<1x1536xf32>
    %64 = math.exp %63 : vector<1x1536xf32>
    %cst_10 = arith.constant 1.000000e+00 : f32
    %65 = vector.broadcast %cst_10 : f32 to vector<1x1536xf32>
    %66 = arith.addf %65, %64 : vector<1x1536xf32>
    %67 = arith.divf %65, %66 : vector<1x1536xf32>
    %68 = arith.mulf %67, %3 : vector<1x1536xf32>
    %69 = vector.broadcast %68 : vector<1x1536xf32> to vector<4x1536xf32>
    %70 = arith.addf %69, %1 : vector<4x1536xf32>
    %c1_i32_11 = arith.constant 1 : i32
    %71 = tpu.dynamic_rotate %70 by %c1_i32_11 dim 1 : vector<4x1536xf32>, i32 -> vector<4x1536xf32>
    %c1535_i32_12 = arith.constant 1535 : i32
    %72 = tpu.dynamic_rotate %70 by %c1535_i32_12 dim 1 : vector<4x1536xf32>, i32 -> vector<4x1536xf32>
    %73 = vector.extract_strided_slice %71 {offsets = [0, 128], sizes = [4, 1024], strides = [1, 1]} : vector<4x1536xf32> to vector<4x1024xf32>
    %74 = vector.extract_strided_slice %70 {offsets = [0, 128], sizes = [4, 1024], strides = [1, 1]} : vector<4x1536xf32> to vector<4x1024xf32>
    %75 = vector.extract_strided_slice %72 {offsets = [0, 128], sizes = [4, 1024], strides = [1, 1]} : vector<4x1536xf32> to vector<4x1024xf32>
    %76 = vector.extract_strided_slice %71 {offsets = [0, 256], sizes = [4, 1024], strides = [1, 1]} : vector<4x1536xf32> to vector<4x1024xf32>
    %77 = vector.extract_strided_slice %70 {offsets = [0, 256], sizes = [4, 1024], strides = [1, 1]} : vector<4x1536xf32> to vector<4x1024xf32>
    %78 = vector.extract_strided_slice %72 {offsets = [0, 256], sizes = [4, 1024], strides = [1, 1]} : vector<4x1536xf32> to vector<4x1024xf32>
    %79 = vector.extract_strided_slice %71 {offsets = [0, 384], sizes = [4, 1024], strides = [1, 1]} : vector<4x1536xf32> to vector<4x1024xf32>
    %80 = vector.extract_strided_slice %70 {offsets = [0, 384], sizes = [4, 1024], strides = [1, 1]} : vector<4x1536xf32> to vector<4x1024xf32>
    %81 = vector.extract_strided_slice %72 {offsets = [0, 384], sizes = [4, 1024], strides = [1, 1]} : vector<4x1536xf32> to vector<4x1024xf32>
    %82 = tpu.concatenate %73, %74, %75, %76, %77, %78, %79, %80, %81 in 0 : vector<4x1024xf32>, vector<4x1024xf32>, vector<4x1024xf32>, vector<4x1024xf32>, vector<4x1024xf32>, vector<4x1024xf32>, vector<4x1024xf32>, vector<4x1024xf32>, vector<4x1024xf32> -> vector<36x1024xf32>
    %c0_13 = arith.constant 0 : index
    %c0_14 = arith.constant 0 : index
    %83 = vector.load %arg4[%c0_13, %c0_14] : memref<4x36xf32, #tpu.memory_space<vmem>>, vector<4x36xf32>
    %cst_15 = arith.constant dense<0.000000e+00> : vector<4x1024xf32>
    %84 = tpu.matmul %83, %82, %cst_15 {dimension_numbers = #tpu.dot_dimension_numbers<[1], [0], [0], [1], [0, 0, 1, 1], [], []>} : vector<4x36xf32>, vector<36x1024xf32>, vector<4x1024xf32> -> vector<4x1024xf32>
    %c0_16 = arith.constant 0 : index
    %c0_17 = arith.constant 0 : index
    %85 = vector.load %arg5[%c0_16, %c0_17] : memref<4x1xf32, #tpu.memory_space<vmem>>, vector<4x1xf32>
    %86 = vector.broadcast %85 : vector<4x1xf32> to vector<4x1024xf32>
    %87 = arith.addf %84, %86 : vector<4x1024xf32>
    %88 = arith.negf %87 : vector<4x1024xf32>
    %89 = math.exp %88 : vector<4x1024xf32>
    %cst_18 = arith.constant 1.000000e+00 : f32
    %90 = vector.broadcast %cst_18 : f32 to vector<4x1024xf32>
    %91 = arith.addf %90, %89 : vector<4x1024xf32>
    %92 = arith.divf %90, %91 : vector<4x1024xf32>
    %c0_19 = arith.constant 0 : index
    %c0_20 = arith.constant 0 : index
    %c0_21 = arith.constant 0 : index
    %c0_22 = arith.constant 0 : index
    %93 = vector.load %arg7[%c0_19, %c0_20, %c0_21, %c0_22] : memref<1x1x4x1024xf32, #tpu.memory_space<vmem>>, vector<1x1x4x1024xf32>
    %94 = vector.shape_cast %93 : vector<1x1x4x1024xf32> to vector<4x1024xf32>
    %95 = vector.shape_cast %92 : vector<4x1024xf32> to vector<1x1x4x1024xf32>
    tpu.vector_store %arg7[%c0_19, %c0_20, %c0_21, %c0_22], %95 {strides = array<i32>} : memref<1x1x4x1024xf32, #tpu.memory_space<vmem>>, vector<1x1x4x1024xf32>,
    return
  }
  func.func @transform_0(%arg0: i32, %arg1: i32) -> i32 {
    %c0_i32 = arith.constant 0 : i32
    %c0_i32_0 = arith.constant 0 : i32
    return %c0_i32 : i32
  }
  func.func @transform_1(%arg0: i32, %arg1: i32) -> (i32, i32, i32) {
    %c0_i32 = arith.constant 0 : i32
    %c0_i32_0 = arith.constant 0 : i32
    %c0_i32_1 = arith.constant 0 : i32
    return %arg1, %c0_i32, %c0_i32_0 : i32, i32, i32
  }
  func.func @transform_2(%arg0: i32, %arg1: i32) -> (i32, i32) {
    %c0_i32 = arith.constant 0 : i32
    %c0_i32_0 = arith.constant 0 : i32
    %c0_i32_1 = arith.constant 0 : i32
    return %c0_i32, %c0_i32_0 : i32, i32
  }
  func.func @transform_3(%arg0: i32, %arg1: i32) -> (i32, i32) {
    %c0_i32 = arith.constant 0 : i32
    %c0_i32_0 = arith.constant 0 : i32
    %c0_i32_1 = arith.constant 0 : i32
    return %c0_i32, %c0_i32_0 : i32, i32
  }
  func.func @transform_4(%arg0: i32, %arg1: i32) -> (i32, i32, i32, i32) {
    %c0_i32 = arith.constant 0 : i32
    %c0_i32_0 = arith.constant 0 : i32
    %c0_i32_1 = arith.constant 0 : i32
    return %arg0, %arg1, %c0_i32, %c0_i32_0 : i32, i32, i32, i32
  }
  func.func @transform_5(%arg0: i32, %arg1: i32) -> (i32, i32, i32, i32) {
    %c0_i32 = arith.constant 0 : i32
    %c0_i32_0 = arith.constant 0 : i32
    %c0_i32_1 = arith.constant 0 : i32
    return %arg0, %arg1, %c0_i32, %c0_i32_0 : i32, i32, i32, i32
  }
}

</mosaic_0001>

<bundles_post_ra>
// kernel: tpu_custom_call.1
= control target key start
LH: loop header
LB: loop body
LE: loop exit
PB: predicated region body
PF: predicated region fallthrough
CT: control target
= control target key end

     0   :  { %s3817_s0 = inlined_call_operand.vmem [shape: f32[12], index: 0, kind: input, shape index: {}]   ;;  %s3818_s1 = inlined_call_operand.hbm [shape: f32[2,1,1536], index: 1, kind: input, shape index: {}]   ;;  %s3819_s2 = inlined_call_operand.vmem [shape: f32[4,36], index: 2, kind: input, shape index: {}]   ;;  %s3820_s3 = inlined_call_operand.vmem [shape: f32[4,1], index: 3, kind: input, shape index: {}]   ;;  %s3821_s4 = inlined_call_operand.hbm [shape: f32[2,2,4,1536], index: 4, kind: input, shape index: {}]   ;;  %s3822_s5 = inlined_call_operand.hbm [shape: f32[2,2,4,1024], index: 5, kind: output, shape index: {}]  }
   0x1   :  { %3864 = sst [smem:[#allocation59_spill]] %s3817_s0 }
   0x2   :  { %3865 = sst [smem:[#allocation60_spill]] %s3818_s1 }
   0x3   :  { %3866 = sst [smem:[#allocation61_spill]] %s3822_s5 }
   0x4   :  { %10 = vsyncpa [#allocation5], 0 }
   0x5   :  { %11 = vsyncpa [#allocation3], 0 }
   0x6   :  { %13 = vsyncpa [#allocation3 + $0x1], 0 }
   0x7   :  { %14 = vsyncpa [#allocation8], 0 }
   0x8   :  { %16 = vsyncpa [#allocation8 + $0x1], 0 }
   0x9   :  { %17 = vsyncpa [#allocation4], 0 }
   0xa   :  { %19 = vsyncpa [#allocation4 + $0x1], 0  ;;  %s2667_s18 = smov 0   ;;  %s2669_s19 = smov 0  }
   0xb   :  { %s2671_s20 = smov 0   ;;  %s2673_s21 = smov 0  }
   0xc   :  { %s2675_s22 = smov 0   ;;  %s2677_s23 = smov 0  }
   0xd   :  { %s2679_s24 = smov 0   ;;  %s2681_s25 = smov 0  }
   0xe   :  { %s2683_s26 = smov 0   ;;  %s2685_s27 = smov 0  }
   0xf   :  { %s2687_s28 = smov 0  }
  0x10 LB: > { %3867 = sst [smem:[#allocation14_spill]] %s2586_s18  ;;  %s2061_s29 = sadd.s32 4294967295, %s2626_s28   ;;  %s2626_s28 = sphi %s2687_s28, %s25_s28   ;;  %s2622_s27 = sphi %s2685_s27, %s3986_s27   ;;  %s2618_s26 = sphi %s2683_s26, %s3978_s26   ;;  %s2614_s25 = sphi %s2681_s25, %s3985_s25   ;;  %s2610_s24 = sphi %s2679_s24, %s3977_s24   ;;  %s2606_s23 = sphi %s2677_s23, %s3976_s23   ;;  %s2602_s22 = sphi %s2675_s22, %s3984_s22   ;;  %s2598_s21 = sphi %s2673_s21, %s3983_s21   ;;  %s2594_s20 = sphi %s2671_s20, %s3982_s20   ;;  %s2590_s19 = sphi %s2669_s19, %s3981_s19   ;;  %s2586_s18 = sphi %s2667_s18, %s3980_s18  }
  0x11   : > { %3868 = sst [smem:[#allocation15_spill]] %s2606_s23  ;;  %p2063_p0 = scmp.ge.s32.totalorder %s2626_s28, 1 }
  0x12   : > { %3869 = sst [smem:[#allocation16_spill]] %s2618_s26  ;;  %p2724_p1 = scmp.eq.s32.totalorder %s2061_s29, 0 }
  0x13   : > { %p2728_p2 = scmp.eq.s32.totalorder %s2061_s29, 3  ;;  %p187_p3 = scmp.lt.s32.totalorder %s2626_s28, 5 }
  0x14   : > { %s3870_s30 = scalar_select %p2724_p1, 1, 0 }
  0x15   : > { %s3871_s6 = scalar_select %p2728_p2, 1, 0 }
  0x16   : > { %s3872_s0 = sld [smem:[#allocation59_spill]]  ;;  %p2736_p4 = pnand %p2063_p0, %p187_p3 }
  0x18   : > { %s3873_s10 = scalar_select %p2736_p4, 1, 0 }
  0x19   : > { %p2187_p5 = pneg %p2736_p4 }
  0x1b   : > { %p2188_p6 = pnand %p2187_p5, %p2724_p1 }
  0x1c   : > { %s200_s9 = sshll.u32 %s3872_s0, 4  ;;  %s201_s9 = int_to_ptr.vmem [resolvable:$true] %s200_s9 }
  0x1d   : > { %s2421_s11 = scalar_lea.vmem %s201_s9, 16  ;;  %p2423_p8 = pneg %p2188_p6 }
  0x1e   : > { %p2422_p7 = scmp.ne.s32.totalorder %s201_s9, %s2421_s11  ;;  %p2429_p11 = scmp.lt.s32.totalorder %s201_s9, %s201_s9 }
  0x1f   : > { %p2430_p12 = scmp.lt.s32.totalorder %s2421_s11, %s2421_s11 }
  0x20   : > { %p2424_p9 = pnand %p2423_p8, %p2422_p7 }
  0x21   : > { %p2431_p13 = por %p2430_p12, %p2429_p11 }
  0x22   : > { %p2425_p10 = pneg %p2424_p9 }
  0x24   : > { %p2432_p2 = pnand %p2431_p13, %p2425_p10 }
  0x26   : > { %2435 = shalt.err (!%p2432_p2)
}
  0x27   : > { %s2628_s12 = smov [#allocation2]   ;;  %s34_s13 = sadd.s32 1, %s2618_s26 }
  0x28   : > { %2190 = dma.vmem_to_smem (!%p2188_p6), %s201_s9, 16, %s2628_s12, [#allocation5]  }
  0x29   : > { %s65_s14 = sadd.s32 1, %s2606_s23  ;;  %p2746_p0 = scmp.ge.s32.totalorder %s34_s13, 2 }
  0x2a   : > { %p72_p2 = scmp.ne.s32.totalorder %s2606_s23, %s2602_s22  ;;  %p3826_p3 = scmp.eq.s32.totalorder %s2626_s28, 0 }
  0x2b   : > { %p78_p5 = scmp.ne.s32.totalorder %s2602_s22, %s2598_s21  ;;  %s3988_s13 = smov (%p2746_p0, %s34_s13), 0 }
  0x2c   : > { %3875 = sst [smem:[#allocation17_spill]] %s3988_s13  ;;  %p74_p7 = por %p3826_p3, %p72_p2 }
  0x2d   : > { %p2763_p6 = por %p2724_p1, %p78_p5  ;;  %s2769_s17 = ssub.s32 %s2618_s26, %s3988_s13 }
  0x2e   : > { %p3825_p8 = scmp.lt.s32.totalorder %s2626_s28, 4  ;;  %p63_p9 = scmp.eq.s32.totalorder %s2769_s17, 0 }
  0x2f   : > { %s3876_s16 = scalar_select %p2763_p6, 1, 0 }
  0x30   : > { %s217_s29 = sand.u32 1, %s2606_s23   ;;  %s2171_s21 = smul.u32 192, %s2618_s26 }
  0x31   : > { %s2170_s7 = smul.u32 12, %s217_s29  ;;  %p2780_p10 = pnand %p3825_p8, %p74_p7 }
  0x32   : > { %s2775_s8 = scalar_select %p63_p9, %s2606_s23, %s65_s14  }
  0x33   : > { %s221_s9 = scalar_lea.vmem [#allocation6], %s2170_s7  ;;  %s3879_s1 = sld [smem:[#allocation60_spill]] }
  0x34   : > { %3877 = sst [smem:[#allocation18_spill]] %s2775_s8  ;;  %s229_s11 = sshll.u32 %s221_s9, 4  ;;  %s2789_s11 = int_to_ptr.vmem [resolvable:$true] %s229_s11 }
  0x35   : > { %s218_s14 = scalar_lea.sflag [#allocation3], %s217_s29  ;;  %p2438_p12 = pneg %p2780_p10 }
  0x39   : > { %s2787_s13 = scalar_lea.hbm %s3879_s1, %s2171_s21  ;;  %s2441_s21 = scalar_lea.hbm %s3879_s1, 384 }
  0x3a   : > { %s2436_s7 = scalar_lea.hbm %s2787_s13, 192  ;;  %p2442_p5 = scmp.lt.u32.totalorder %s2787_s13, %s3879_s1 }
  0x3b   : > { %p2437_p11 = scmp.ne.s32.totalorder %s2787_s13, %s2436_s7  ;;  %p2443_p7 = scmp.lt.u32.totalorder %s2441_s21, %s2436_s7 }
  0x3c   : > { %p2445_p8 = scmp.lt.u32.totalorder %s2436_s7, %s2787_s13 }
  0x3d   : > { %p2439_p13 = pnand %p2438_p12, %p2437_p11  ;;  %p2444_p9 = por %p2443_p7, %p2442_p5 }
  0x3f   : > { %p2440_p2 = pneg %p2439_p13  ;;  %p2446_p3 = por %p2445_p8, %p2444_p9 }
  0x41   : > { %p2447_p6 = pnand %p2446_p3, %p2440_p2 }
  0x43   : > { %2450 = shalt.err (!%p2447_p6)
}
  0x44   : > { %s2451_s29 = scalar_lea.vmem %s2789_s11, 192  ;;  %s2629_s0 = smov [#allocation6]  }
  0x45   : > { %p2452_p11 = scmp.ne.s32.totalorder %s2789_s11, %s2451_s29  ;;  %s2456_s5 = sshll.u32 %s2629_s0, 4  ;;  %s2457_s5 = int_to_ptr.vmem [resolvable:$false] %s2456_s5 }
  0x46   : > { %s2458_s8 = scalar_lea.vmem %s2457_s5, 384  ;;  %p2459_p1 = scmp.lt.s32.totalorder %s2789_s11, %s2457_s5 }
  0x47   : > { %p2454_p13 = pnand %p2452_p11, %p2438_p12  ;;  %p2460_p5 = scmp.lt.s32.totalorder %s2458_s8, %s2451_s29 }
  0x49   : > { %p2455_p4 = pneg %p2454_p13  ;;  %p2461_p7 = por %p2460_p5, %p2459_p1 }
  0x4b   : > { %p2462_p8 = pnand %p2461_p7, %p2455_p4 }
  0x4d   : > { %2465 = shalt.err (!%p2462_p8)
}
  0x4e   : > { %2194 = dma.hbm_to_vmem [thread:$0]  (!%p2780_p10), %s2787_s13, 192, %s2789_s11, %s218_s14  }
  0x4f   : > { %s2062_s7 = sadd.s32 4294967294, %s2626_s28   ;;  %s37_s12 = sadd.s32 1, %s2622_s27 }
  0x50   : > { %s135_s21 = sadd.s32 1, %s2594_s20  ;;  %s3990_s12 = smov (!%p2746_p0, %s37_s12), %s2622_s27 }
  0x51   : > { %p142_p1 = scmp.ne.s32.totalorder %s2594_s20, %s2590_s19  ;;  %p148_p4 = scmp.ne.s32.totalorder %s2590_s19, %s2586_s18 }
  0x52   : > { %p39_p3 = scmp.ge.s32.totalorder %s3990_s12, 2  ;;  %p180_p6 = scmp.eq.s32.totalorder %s2062_s7, 3 }
  0x53   : > { %p3880_p12 = scmp.eq.s32.totalorder %s2626_s28, 0  ;;  %p3881_p9 = scmp.ne.s32.totalorder %s3870_s30, 0 }
  0x54   : > { %s3992_s12 = smov (%p39_p3, %s3990_s12), 0  ;;  %p3884_p10 = scmp.ne.s32.totalorder %s3871_s6, 0 }
  0x55   : > { %p144_p2 = por %p142_p1, %p3880_p12  ;;  %p2830_p11 = por %p148_p4, %p3881_p9 }
  0x56   : > { %3883 = sst [smem:[#allocation19_spill]] %s3992_s12  ;;  %p2838_p13 = por %p3884_p10, %p142_p1 }
  0x57   : > { %p2842_p0 = por %p180_p6, %p148_p4  ;;  %s130_s11 = ssub.s32 %s2622_s27, %s3992_s12 }
  0x58   : > { %s3885_s13 = scalar_select %p2838_p13, 1, 0 }
  0x59   : > { %s3886_s15 = scalar_select %p2842_p0, 1, 0 }
  0x5a   : > { %s236_s14 = sand.u32 1, %s2594_s20   ;;  %s132_s29 = sor.u32 %s130_s11, %s2769_s17 }
  0x5b   : > { %3887 = sst [smem:[#allocation20_spill]] %s3886_s15  ;;  %p133_p5 = scmp.eq.s32.totalorder %s132_s29, 0 }
  0x5c   : > { %s2172_s0 = smul.u32 48, %s236_s14  ;;  %p3888_p7 = scmp.lt.s32.totalorder %s2626_s28, 4 }
  0x5d   : > { %s2173_s5 = smul.u32 12, %s2618_s26  ;;  %s237_s26 = scalar_lea.sflag [#allocation8], %s236_s14 }
  0x5e   : > { %p2853_p8 = pnand %p3888_p7, %p144_p2  ;;  %s2174_s7 = smul.u32 24, %s2622_s27 }
  0x5f   : > { %s2858_s6 = scalar_select %p133_p5, %s2594_s20, %s135_s21  }
  0x60   : > { %s240_s1 = scalar_lea.vmem [#allocation7], %s2172_s0  ;;  %s246_s18 = sadd.s32 %s2174_s7, %s2173_s5 }
  0x61   : > { %s250_s23 = sshll.u32 %s240_s1, 4  ;;  %s2067_s12 = sshll.u32 %s246_s18, 6  ;;  %s2861_s23 = int_to_ptr.vmem [resolvable:$true] %s250_s23 }
  0x62   : > { %s2866_s29 = scalar_lea.hbm %s3821_s4, %s2067_s12  ;;  %p2468_p4 = pneg %p2853_p8 }
  0x63   : > { %s2466_s15 = scalar_lea.hbm %s2866_s29, 768  ;;  %s2471_s21 = scalar_lea.hbm %s3821_s4, 3072 }
  0x64   : > { %p2467_p1 = scmp.ne.s32.totalorder %s2866_s29, %s2466_s15  ;;  %p2472_p12 = scmp.lt.u32.totalorder %s2866_s29, %s3821_s4 }
  0x65   : > { %p2473_p2 = scmp.lt.u32.totalorder %s2471_s21, %s2466_s15  ;;  %p2475_p10 = scmp.lt.u32.totalorder %s2466_s15, %s2866_s29 }
  0x66   : > { %p2469_p3 = pnand %p2468_p4, %p2467_p1 }
  0x67   : > { %p2474_p9 = por %p2473_p2, %p2472_p12 }
  0x68   : > { %p2470_p6 = pneg %p2469_p3 }
  0x69   : > { %p2476_p5 = por %p2475_p10, %p2474_p9 }
  0x6b   : > { %p2477_p7 = pnand %p2476_p5, %p2470_p6 }
  0x6d   : > { %2480 = shalt.err (!%p2477_p7)
}
  0x6e   : > { %s2481_s14 = scalar_lea.vmem %s2861_s23, 768  ;;  %s2630_s5 = smov [#allocation7]  }
  0x6f   : > { %p2482_p1 = scmp.ne.s32.totalorder %s2861_s23, %s2481_s14  ;;  %s2486_s7 = sshll.u32 %s2630_s5, 4  ;;  %s2487_s7 = int_to_ptr.vmem [resolvable:$false] %s2486_s7 }
  0x70   : > { %s2488_s17 = scalar_lea.vmem %s2487_s7, 1536  ;;  %p2489_p13 = scmp.lt.s32.totalorder %s2861_s23, %s2487_s7 }
  0x71   : > { %p2484_p3 = pnand %p2482_p1, %p2468_p4  ;;  %p2490_p12 = scmp.lt.s32.totalorder %s2488_s17, %s2481_s14 }
  0x73   : > { %p2485_p0 = pneg %p2484_p3  ;;  %p2491_p2 = por %p2490_p12, %p2489_p13 }
  0x75   : > { %p2492_p9 = pnand %p2491_p2, %p2485_p0 }
  0x77   : > { %2495 = shalt.err (!%p2492_p9)
}
  0x78   : > { %2197 = dma.hbm_to_vmem [thread:$0]  (!%p2853_p8), %s2866_s29, 768, %s2861_s23, %s237_s26  }
  0x79   : > { %p3890_p6 = scmp.ne.s32.totalorder %s3873_s10, 0 }
  0x7b   : > { %259 = sbr.rel (%p3890_p6) target bundleno = 986 (0x3da), region = 40 }
  0x82   : > { %p3891_p4 = scmp.ne.s32.totalorder %s3870_s30, 0 }
  0x84   : > { %2569 = dma.done.wait (%p3891_p4), [#allocation5], 16  }
  0x85   : > { %2571 = vsyncadd (%p3891_p4), [#allocation5], 4294967280  ;;  %s265_s15 = sand.u32 1, %s2602_s22   ;;  %p3892_p13 = scmp.ne.s32.totalorder %s3876_s16, 0 }
  0x86   : > { %s2900_s11 = smul.u32 12, %s265_s15  ;;  %s266_s1 = scalar_lea.sflag [#allocation3], %s265_s15 }
  0x88   : > { %s269_s8 = scalar_lea.vmem [#allocation6], %s2900_s11 }
  0x89   : > { %2573 = dma.done.wait (%p3892_p13), %s266_s1, 192  }
  0x8a   : > { %2575 = vsyncadd (%p3892_p13), %s266_s1, 4294967104  ;;  %s2908_s23 = sand.u32 1, %s2590_s19  }
  0x8b   : > { %s2176_s26 = smul.u32 48, %s2908_s23  ;;  %s275_s30 = scalar_lea.sflag [#allocation8], %s2908_s23 }
  0x8d   : > { %s2912_s10 = scalar_lea.vmem [#allocation7], %s2176_s26 }
  0x8e   : > { %2577 = dma.done.wait (%p2830_p11), %s275_s30, 768  }
  0x8f   : > { %2579 = vsyncadd (%p2830_p11), %s275_s30, 4294966528 }
  0x90   : > { %283 = sfence }
  0x91   : > { %v311_v0 = vld [vmem:[%s2912_s10] sm:$0xff]  ;;  %vm335_vm0 = vcmask 1043456   ;;  %v2920_v1 = vld [vmem:[%s2912_s10 + $0x8] sm:$0xff]  ;;  %v3837_v4 = vmov 0.0   ;;  %v2931_v5 = vld [vmem:[%s2912_s10 + $0x10] sm:$0xff]  ;;  %vm331_vm1 = vcmask 31744   ;;  %v828_v14 = vlaneseq }
  0x92   : > { %3893 = vst [vmem:[#allocation21_spill] sm:$0xff] %v2920_v1  ;;  %v2922_v2 = vcombine.high %v311_v0, %v311_v0  ;;  %v2926_v3 = vcombine.high %v2920_v1, %v2920_v1  ;;  %424 = vmatprep.mubr.f32.mxu0 %v3837_v4  ;;  %495 = vmatprep.mubr.f32.mxu1 %v3837_v4  ;;  %3896 = vst [vmem:[#allocation24_spill] sm:$0xff] %v2931_v5  ;;  %v314_v6 = vld [vmem:[%s2912_s10 + $0x18] sm:$0xff]  ;;  %v316_v9 = vld [vmem:[%s2912_s10 + $0x28] sm:$0xff]  ;;  %v2632_v11 = vmov 1.0   ;;  %s786_s16 = sld [smem:[#allocation2]] }
  0x93   : > { %v2936_v7 = vcombine.high %v2931_v5, %v2931_v5  ;;  %v2942_v8 = vcombine.high %v314_v6, %v314_v6  ;;  %v315_v10 = vld [vmem:[%s2912_s10 + $0x20] sm:$0xff]  ;;  %v2954_v12 = vcombine.high %v316_v9, %v316_v9  ;;  %s2089_s9 = sld [smem:[#allocation2 + $0x1]]  ;;  %v2979_v15 = vshrl.u32 %v828_v14, 7  ;;  %s2633_s29 = smov 1  }
  0x94   : > { %3894 = vst [vmem:[#allocation22_spill] sm:$0xff] %v2922_v2  ;;  %3895 = vst [vmem:[#allocation23_spill] sm:$0xff] %v2926_v3  ;;  %2071 = vmatprep.subr.msk.mxu0 %vm335_vm0, %v2922_v2  ;;  %2074 = vmatprep.subr.msk.mxu1 %vm335_vm0, %v2926_v3  ;;  %v2960_v13 = vcombine.high %v315_v10, %v315_v10  ;;  %v2989_v19 = vld [vmem:[%s269_s8] sm:$0xff]  ;;  %s2634_s18 = smov 127   ;;  %s2097_s21 = sld [smem:[#allocation2 + $0xa]]  ;;  %vm1549_vm4 = vcmask 293888  }
  0x95   : > { %3897 = vst [vmem:[#allocation25_spill] sm:$0xff] %v2936_v7  ;;  %3898 = vst [vmem:[#allocation26_spill] sm:$0xff] %v2942_v8  ;;  %2072 = vmatpush1.msk.msra.mxu0 %vm335_vm0, %v311_v0  ;;  %2075 = vmatpush1.msk.msra.mxu1 %vm335_vm0, %v2920_v1  ;;  %v2984_v17 = vsub.s32 0, %v2979_v15  ;;  %v838_v18 = vsub.s32 2, %v2979_v15  ;;  %v834_v40 = vsub.s32 1, %v2979_v15  ;;  %v842_v41 = vsub.s32 3, %v2979_v15 }
  0x96   : > { %2073 = vmatmul.mubr.msk.f32.vlgmr.msra.gmra.mrb[0].mxu0 %vm331_vm1, %v2632_v11  ;;  %2076 = vmatmul.mubr.msk.f32.vlgmr.msra.gmra.mrb[0].mxu1 %vm331_vm1, %v2632_v11  ;;  %3899 = vst [vmem:[#allocation27_spill] sm:$0xff] %v2954_v12  ;;  %3900 = vst [vmem:[#allocation28_spill] sm:$0xff] %v2960_v13  ;;  %v846_v49 = vsub.s32 4, %v2979_v15  ;;  %v854_v60 = vsub.s32 6, %v2979_v15  ;;  %s2091_s0 = sld [smem:[#allocation2 + $0x4]]  ;;  %s2090_s12 = sld [smem:[#allocation2 + $0x3]] }
  0x97   : > { %2077 = vmatprep.subr.msk.mxu0 %vm335_vm0, %v2936_v7  ;;  %566 = vmatprep.mubr.f32.mxu0 %v3837_v4  ;;  %3901 = vst [vmem:[#allocation29_spill] sm:$0xff] %v2984_v17  ;;  %v2997_v27 = vrot.slane %v2989_v19, %v2984_v17  ;;  %v3002_v28 = vrot.slane %v2989_v19, %v838_v18  ;;  %s2094_s14 = sld [smem:[#allocation2 + $0x7]]  ;;  %s2093_s5 = sld [smem:[#allocation2 + $0x6]] }
  0x98   : > { %2078 = vmatpush1.msk.msra.mxu0 %vm335_vm0, %v2931_v5  ;;  %2080 = vmatprep.subr.msk.mxu1 %vm335_vm0, %v2942_v8  ;;  %v2981_v16 = vstv %s786_s16  ;;  %v3029_v54 = vrot.slane %v2989_v19, %v834_v40  ;;  %v3032_v56 = vrot.slane %v2989_v19, %v842_v41  ;;  %v3035_v58 = vrot.slane %v2989_v19, %v846_v49  ;;  %s2096_s7 = sld [smem:[#allocation2 + $0x9]]  ;;  %s2092_s17 = sld [smem:[#allocation2 + $0x5]] }
  0x99   : > { %2081 = vmatpush1.msk.msra.mxu1 %vm335_vm0, %v314_v6  ;;  %637 = vmatprep.mubr.f32.mxu1 %v3837_v4  ;;  %v2991_v21 = vstv %s2089_s9  ;;  %3902 = vst [vmem:[#allocation30_spill] sm:$0xff] %v2997_v27  ;;  %3903 = vst [vmem:[#allocation31_spill] sm:$0xff] %v3002_v28  ;;  %s2095_s15 = sld [smem:[#allocation2 + $0x8]]  ;;  %s2098_s11 = sld [smem:[#allocation2 + $0xb]] }
  0x9a   : > { %2079 = vmatmul.mubr.msk.f32.vlgmr.msra.gmra.mrb[2].mxu0 %vm331_vm1, %v2632_v11  ;;  %2082 = vmatmul.mubr.msk.f32.vlgmr.msra.gmra.mrb[2].mxu1 %vm331_vm1, %v2632_v11  ;;  %3904 = vst [vmem:[#allocation32_spill] sm:$0xff] %v3029_v54  ;;  %3905 = vst [vmem:[#allocation33_spill] sm:$0xff] %v3032_v56  ;;  %s2099_s1 = sld [smem:[#allocation2 + $0x2]]  ;;  %s2070_s16 = sshll.u32 %s2908_s23, 5 }
  0x9b   : > { %2086 = vmatprep.subr.msk.mxu1 %vm335_vm0, %v2954_v12  ;;  %779 = vmatprep.mubr.f32.mxu1 %v3837_v4  ;;  %3906 = vst [vmem:[#allocation34_spill] sm:$0xff] %v3035_v58  ;;  %s310_s9 = scalar_lea.vmem [#allocation9], %s2070_s16  ;;  %p3971_p0 = scmp.ne.s32.totalorder %s3885_s13, 0 }
  0x9c   : > { %2087 = vmatpush1.msk.msra.mxu1 %vm335_vm0, %v316_v9  ;;  %2083 = vmatprep.subr.msk.mxu0 %vm335_vm0, %v2960_v13  ;;  %v3054_v9 = vrot.slane %v2989_v19, %v854_v60 }
  0x9d   : > { %2084 = vmatpush1.msk.msra.mxu0 %vm335_vm0, %v315_v10  ;;  %708 = vmatprep.mubr.f32.mxu0 %v3837_v4  ;;  %v3161_v60 = vstv %s2094_s14 }
  0x9e   : > { %2088 = vmatmul.mubr.msk.f32.vlgmr.msra.gmra.mrb[4].mxu1 %vm331_vm1, %v2632_v11  ;;  %2085 = vmatmul.mubr.msk.f32.vlgmr.msra.gmra.mrb[4].mxu0 %vm331_vm1, %v2632_v11  ;;  %3907 = vst [vmem:[#allocation35_spill] sm:$0xff] %v3054_v9 }
  0x9f   : > { %1705 = vmatprep.mubr.f32.mxu1 %v3837_v4  ;;  %1634 = vmatprep.mubr.f32.mxu0 %v3837_v4 }
 0x169   : > { %v426_v20 = vpop.f32.mrb[0].mxu0  ;;  %v497_v22 = vpop.f32.mrb[0].mxu1 }
 0x16a   : > { %v788_v23 = vmul.f32 %v2981_v16, %v426_v20  ;;  %v790_v24 = vmul.f32 %v2981_v16, %v497_v22  ;;  %v428_v25 = vpop.f32.mrb[1].mxu0  ;;  %v499_v26 = vpop.f32.mrb[1].mxu1  ;;  %v850_v20 = vsub.s32 5, %v2979_v15 }
 0x16b   : > { %v789_v31 = vmul.f32 %v2981_v16, %v428_v25  ;;  %v791_v32 = vmul.f32 %v2981_v16, %v499_v26 }
 0x16c   : > { %v802_v29 = vadd.f32 %v2991_v21, %v788_v23  ;;  %v804_v30 = vadd.f32 %v2991_v21, %v790_v24  ;;  %v318_v24 = vld [vmem:[%s269_s8 + $0x8] sm:$0xf]  ;;  %v3074_v26 = vrot.slane %v2989_v19, %v850_v20  ;;  %v3177_v20 = vstv %s2093_s5 }
 0x16d   : > { %v568_v33 = vpop.f32.mrb[2].mxu0  ;;  %v639_v34 = vpop.f32.mrb[2].mxu1  ;;  %v803_v44 = vadd.f32 %v2991_v21, %v789_v31  ;;  %v805_v45 = vadd.f32 %v2991_v21, %v791_v32  ;;  %v3079_v31 = vrot.slane %v318_v24, %v838_v18 }
 0x16e   : > { %v814_v35 = vmax.f32 %v802_v29, 0.0  ;;  %v816_v36 = vmax.f32 %v804_v30, 0.0  ;;  %v792_v37 = vmul.f32 %v2981_v16, %v568_v33  ;;  %v570_v38 = vpop.f32.mrb[3].mxu0  ;;  %v641_v39 = vpop.f32.mrb[3].mxu1  ;;  %v794_v50 = vmul.f32 %v2981_v16, %v639_v34  ;;  %3908 = vst [vmem:[#allocation36_spill] sm:$0xff] %v3074_v26 }
 0x16f   : > { %v815_v53 = vmax.f32 %v803_v44, 0.0  ;;  %v817_v55 = vmax.f32 %v805_v45, 0.0  ;;  %v793_v63 = vmul.f32 %v2981_v16, %v570_v38  ;;  %3909 = vst [vmem:[#allocation37_spill] sm:$0xff] %v3079_v31  ;;  %v795_v33 = vmul.f32 %v2981_v16, %v641_v39 }
 0x170   : > { %v3012_v42 = vmul.f32 %v2997_v27, %v814_v35  ;;  %v3015_v43 = vmul.f32 %v3002_v28, %v816_v36  ;;  %v806_v48 = vadd.f32 %v2991_v21, %v792_v37  ;;  %v808_v59 = vadd.f32 %v2991_v21, %v794_v50 }
 0x171   : > { %v781_v46 = vpop.f32.mrb[4].mxu1  ;;  %v710_v47 = vpop.f32.mrb[4].mxu0  ;;  %v3044_v61 = vmul.f32 %v3029_v54, %v815_v53  ;;  %v3047_v62 = vmul.f32 %v3032_v56, %v817_v55  ;;  %v807_v11 = vadd.f32 %v2991_v21, %v793_v63  ;;  %v809_v36 = vadd.f32 %v2991_v21, %v795_v33 }
 0x172   : > { %904 = vrot.lane.b32.xlu1 %v3015_v43, %s2633_s29  ;;  %900 = vrot.lane.b32.xlu0 %v3012_v42, %s2633_s29  ;;  %v783_v51 = vpop.f32.mrb[5].mxu1  ;;  %v712_v52 = vpop.f32.mrb[5].mxu0  ;;  %v818_v57 = vmax.f32 %v806_v48, 0.0  ;;  %v820_v6 = vmax.f32 %v808_v59, 0.0  ;;  %v798_v10 = vmul.f32 %v2981_v16, %v781_v46  ;;  %v796_v18 = vmul.f32 %v2981_v16, %v710_v47 }
 0x173   : > { %v819_v25 = vmax.f32 %v807_v11, 0.0  ;;  %v799_v29 = vmul.f32 %v2981_v16, %v783_v51  ;;  %v858_v37 = vsub.s32 7, %v2979_v15  ;;  %v3100_v44 = vrot.slane %v318_v24, %v842_v41 }
 0x174   : > { %v3051_v0 = vmul.f32 %v3035_v58, %v818_v57  ;;  %v3064_v22 = vmul.f32 %v3054_v9, %v820_v6  ;;  %v812_v23 = vadd.f32 %v2991_v21, %v798_v10  ;;  %v810_v39 = vadd.f32 %v2991_v21, %v796_v18 }
 0x175   : > { %v3086_v32 = vmul.f32 %v3074_v26, %v819_v25  ;;  %v813_v34 = vadd.f32 %v2991_v21, %v799_v29  ;;  %3910 = vst [vmem:[#allocation38_spill] sm:$0xff] %v3100_v44  ;;  %v821_v45 = vmax.f32 %v809_v36, 0.0  ;;  %v3108_v46 = vrot.slane %v2989_v19, %v858_v37 }
 0x176   : > { %995 = vrot.lane.b32.xlu1 %v3015_v43, %s2634_s18  ;;  %991 = vrot.lane.b32.xlu0 %v3012_v42, %s2634_s18  ;;  %v824_v30 = vmax.f32 %v812_v23, 0.0  ;;  %v797_v48 = vmul.f32 %v2981_v16, %v712_v52  ;;  %v822_v49 = vmax.f32 %v810_v39, 0.0  ;;  %v3115_v41 = vrot.slane %v318_v24, %v2984_v17 }
 0x177   : > { %v825_v38 = vmax.f32 %v813_v34, 0.0  ;;  %3911 = vst [vmem:[#allocation39_spill] sm:$0xff] %v3108_v46  ;;  %v3122_v50 = vmul.f32 %v3108_v46, %v821_v45  ;;  %v3134_v52 = vrot.slane %v318_v24, %v834_v40  ;;  %v3152_v15 = vand.u32 127, %v828_v14 }
 0x178   : > { %v3091_v35 = vmul.f32 %v3079_v31, %v824_v30  ;;  %3912 = vst [vmem:[#allocation40_spill] sm:$0xff] %v3115_v41  ;;  %v811_v19 = vadd.f32 %v2991_v21, %v797_v48  ;;  %v3126_v51 = vmul.f32 %v3115_v41, %v822_v49  ;;  %v3156_v55 = vstv %s2097_s21 }
 0x179   : > { %v3111_v47 = vmul.f32 %v3100_v44, %v825_v38  ;;  %3913 = vst [vmem:[#allocation41_spill] sm:$0xff] %v3134_v52  ;;  %v966_v57 = vstv %s2091_s0  ;;  %vm926_vm2 = vcmp.lt.s32.totalorder %v3152_v15, 1  ;;  %v3159_v59 = vstv %s2090_s12  ;;  %s1939_s12 = sshll.u32 %s310_s9, 4  ;;  %s3756_s12 = int_to_ptr.vmem [resolvable:$true] %s1939_s12 }
 0x17a   : > { %906 = vrot.lane.b32.xlu1 %v3047_v62, %s2633_s29  ;;  %902 = vrot.lane.b32.xlu0 %v3044_v61, %s2633_s29  ;;  %v823_v16 = vmax.f32 %v811_v19, 0.0  ;;  %v3165_v63 = vmul.f32 %v3156_v55, %v3012_v42  ;;  %v3169_v14 = vmul.f32 %v3156_v55, %v3015_v43  ;;  %v3173_v6 = vmul.f32 %v3156_v55, %v3044_v61 }
 0x17b   : > { %v3179_v23 = vstv %s2096_s7  ;;  %v971_v24 = vmul.f32 %v966_v57, %v3047_v62  ;;  %v970_v25 = vmul.f32 %v966_v57, %v3015_v43  ;;  %v969_v29 = vmul.f32 %v966_v57, %v3044_v61  ;;  %s3970_s7 = sld [smem:[#allocation61_spill]] }
 0x17c   : > { %v3141_v21 = vmul.f32 %v3134_v52, %v823_v16  ;;  %3914 = vst [vmem:[#allocation42_spill] sm:$0xff] %v3165_v63  ;;  %vm1015_vm3 = vcmp.lt.s32.totalorder %v3152_v15, 127  ;;  %v3185_v30 = vstv %s2092_s17  ;;  %v3187_v33 = vstv %s2095_s15  ;;  %s2636_s15 = smov [#allocation9]  }
 0x17d   : > { %v3189_v34 = vstv %s2098_s11  ;;  %v1084_v18 = vmul.f32 %v3161_v60, %v3015_v43  ;;  %v3195_v36 = vmul.f32 %v3161_v60, %v3047_v62  ;;  %v3199_v37 = vmul.f32 %v3156_v55, %v3047_v62  ;;  %s2500_s11 = sshll.u32 %s2636_s15, 4  ;;  %s2501_s11 = int_to_ptr.vmem [resolvable:$false] %s2500_s11 }
 0x17e   : > { %993 = vrot.lane.b32.xlu0 %v3044_v61, %s2634_s18  ;;  %999 = vrot.lane.b32.xlu1 %v3051_v0, %s2634_s18  ;;  %v3202_v38 = vmul.f32 %v966_v57, %v3051_v0  ;;  %v3206_v48 = vstv %s2099_s1  ;;  %v3209_v49 = vmul.f32 %v966_v57, %v3086_v32  ;;  %v3212_v43 = vmul.f32 %v966_v57, %v3064_v22  ;;  %s2502_s1 = scalar_lea.vmem %s2501_s11, 1024  ;;  %p2503_p5 = scmp.lt.s32.totalorder %s3756_s12, %s2501_s11 }
 0x17f   : > { %v3215_v19 = vmul.f32 %v966_v57, %v3111_v47  ;;  %v3221_v16 = vmul.f32 %v966_v57, %v3012_v42  ;;  %v3225_v4 = vmul.f32 %v3161_v60, %v3044_v61  ;;  %v3229_v12 = vmul.f32 %v3161_v60, %v3051_v0 }
 0x180   : > { %v3234_v31 = vmul.f32 %v3156_v55, %v3051_v0  ;;  %v3238_v13 = vmul.f32 %v3161_v60, %v3086_v32  ;;  %v3242_v52 = vmul.f32 %v3156_v55, %v3086_v32  ;;  %v3247_v41 = vmul.f32 %v966_v57, %v3122_v50 }
 0x181   : > { %v3251_v8 = vmul.f32 %v3161_v60, %v3012_v42  ;;  %v3267_v9 = vmul.f32 %v966_v57, %v3126_v51  ;;  %v3271_v42 = vmul.f32 %v3161_v60, %v3122_v50  ;;  %v3281_v7 = vmul.f32 %v3161_v60, %v3126_v51 }
 0x182   : > { %997 = vrot.lane.b32.xlu0 %v3047_v62, %s2634_s18  ;;  %1003 = vrot.lane.b32.xlu1 %v3064_v22, %s2634_s18  ;;  %v3290_v63 = vmul.f32 %v966_v57, %v3091_v35  ;;  %v3298_v3 = vmul.f32 %v3161_v60, %v3091_v35  ;;  %v3309_v56 = vmul.f32 %v3156_v55, %v3091_v35 }
 0x183   : > { %3915 = vst [vmem:[#allocation43_spill] sm:$0xff] %v3281_v7 }
 0x184   : > { %3917 = vst [vmem:[#allocation45_spill] sm:$0xff] %v3290_v63  ;;  %3919 = vst [vmem:[#allocation47_spill] sm:$0xff] %v3298_v3 }
 0x185   : > { %3921 = vst [vmem:[#allocation49_spill] sm:$0xff] %v3309_v56 }
 0x186   : > { %908 = vrot.lane.b32.xlu0 %v3051_v0, %s2633_s29  ;;  %910 = vrot.lane.b32.xlu1 %v3086_v32, %s2633_s29  ;;  %v3255_v0 = vmul.f32 %v3161_v60, %v3064_v22 }
 0x18a   : > { %912 = vrot.lane.b32.xlu0 %v3064_v22, %s2633_s29  ;;  %920 = vrot.lane.b32.xlu1 %v3091_v35, %s2633_s29 }
 0x18e   : > { %922 = vrot.lane.b32.xlu1 %v3111_v47, %s2633_s29  ;;  %1001 = vrot.lane.b32.xlu0 %v3086_v32, %s2634_s18 }
 0x192   : > { %914 = vrot.lane.b32.xlu1 %v3122_v50, %s2633_s29  ;;  %1013 = vrot.lane.b32.xlu0 %v3111_v47, %s2634_s18 }
 0x196   : > { %1005 = vrot.lane.b32.xlu1 %v3122_v50, %s2634_s18  ;;  %916 = vrot.lane.b32.xlu0 %v3126_v51, %s2633_s29 }
 0x19a   : > { %1007 = vrot.lane.b32.xlu0 %v3126_v51, %s2634_s18  ;;  %1009 = vrot.lane.b32.xlu1 %v3141_v21, %s2634_s18 }
 0x19e   : > { %918 = vrot.lane.b32.xlu0 %v3141_v21, %s2633_s29  ;;  %1011 = vrot.lane.b32.xlu1 %v3091_v35, %s2634_s18 }
 0x1e4   : > { %v905_v40 = vpop.permute.xlu1 %904  ;;  %v3154_v53 = vpop.permute.xlu0 %900 }
 0x1e8   : > { %v996_v10 = vpop.permute.xlu1 %995  ;;  %v3175_v11 = vpop.permute.xlu0 %991 }
 0x1ec   : > { %v3204_v39 = vpop.permute.xlu1 %906  ;;  %v903_v45 = vpop.permute.xlu0 %902 }
 0x1ed   : > { %v937_v62 = vsel %vm926_vm2, %v3154_v53, %v903_v45  ;;  %v936_v61 = vsel %vm926_vm2, %v903_v45, %v905_v40  ;;  %v935_v46 = vsel %vm926_vm2, %v905_v40, %v3204_v39  ;;  %v3264_v45 = vmul.f32 %v3156_v55, %v3064_v22 }
 0x1ee   : > { %v943_v44 = vmul.f32 %v3159_v59, %v937_v62  ;;  %v3277_v40 = vmul.f32 %v3156_v55, %v3122_v50  ;;  %v3285_v22 = vmul.f32 %v3156_v55, %v3126_v51  ;;  %v944_v54 = vmul.f32 %v3159_v59, %v936_v61 }
 0x1ef   : > { %v945_v58 = vmul.f32 %v3159_v59, %v935_v46  ;;  %v3294_v50 = vmul.f32 %v966_v57, %v3141_v21  ;;  %v3302_v51 = vmul.f32 %v3161_v60, %v3111_v47  ;;  %v3313_v57 = vmul.f32 %v3156_v55, %v3111_v47 }
 0x1f0   : > { %v994_v32 = vpop.permute.xlu0 %993  ;;  %v3260_v2 = vpop.permute.xlu1 %999  ;;  %3916 = vst [vmem:[#allocation44_spill] sm:$0xff] %v3285_v22  ;;  %v981_v26 = vadd.f32 %v969_v29, %v943_v44  ;;  %v1058_v44 = vmul.f32 %v3177_v20, %v936_v61  ;;  %v982_v35 = vadd.f32 %v970_v25, %v944_v54  ;;  %v1136_v63 = vmul.f32 %v3179_v23, %v935_v46 }
 0x1f1   : > { %v1025_v27 = vsel %vm1015_vm3, %v994_v32, %v996_v10  ;;  %3918 = vst [vmem:[#allocation46_spill] sm:$0xff] %v3294_v50  ;;  %3920 = vst [vmem:[#allocation48_spill] sm:$0xff] %v3302_v51  ;;  %v983_v28 = vadd.f32 %v971_v24, %v945_v58  ;;  %v1059_v50 = vmul.f32 %v3177_v20, %v935_v46 }
 0x1f2   : > { %v1032_v5 = vmul.f32 %v3185_v30, %v1025_v27  ;;  %3922 = vst [vmem:[#allocation50_spill] sm:$0xff] %v3313_v57  ;;  %v3342_v58 = vmul.f32 %v3179_v23, %v937_v62  ;;  %v3345_v24 = vmul.f32 %v3179_v23, %v936_v61 }
 0x1f4   : > { %v1044_v29 = vadd.f32 %v1032_v5, %v981_v26  ;;  %v998_v1 = vpop.permute.xlu0 %997  ;;  %v3305_v17 = vpop.permute.xlu1 %1003  ;;  %v3322_v5 = vmul.f32 %v3161_v60, %v3141_v21  ;;  %v3326_v26 = vmul.f32 %v3156_v55, %v3141_v21  ;;  %v3338_v60 = vsel %vm1015_vm3, %v3175_v11, %v994_v32 }
 0x1f5   : > { %v1023_v3 = vsel %vm1015_vm3, %v998_v1, %v3260_v2  ;;  %v1024_v51 = vsel %vm1015_vm3, %v996_v10, %v998_v1  ;;  %v3333_v1 = vmul.f32 %v3177_v20, %v937_v62  ;;  %3925 = vst [vmem:[#allocation53_spill] sm:$0xff] %v3338_v60  ;;  %v3357_v62 = vmul.f32 %v3187_v33, %v3338_v60 }
 0x1f6   : > { %3923 = vst [vmem:[#allocation51_spill] sm:$0xff] %v3322_v5  ;;  %3924 = vst [vmem:[#allocation52_spill] sm:$0xff] %v3326_v26  ;;  %v1070_v56 = vadd.f32 %v1058_v44, %v1044_v29  ;;  %v1033_v47 = vmul.f32 %v3185_v30, %v1024_v51  ;;  %v1034_v57 = vmul.f32 %v3185_v30, %v1023_v3 }
 0x1f7   : > { %v1110_v55 = vmul.f32 %v3187_v33, %v1024_v51  ;;  %v1111_v61 = vmul.f32 %v3187_v33, %v1023_v3 }
 0x1f8   : > { %v1045_v21 = vadd.f32 %v1033_v47, %v982_v35  ;;  %v1096_v54 = vadd.f32 %v1084_v18, %v1070_v56  ;;  %v909_v10 = vpop.permute.xlu0 %908  ;;  %v911_v25 = vpop.permute.xlu1 %910  ;;  %v1046_v44 = vadd.f32 %v1034_v57, %v983_v28  ;;  %v1031_v35 = vmul.f32 %v3185_v30, %v3338_v60 }
 0x1f9   : > { %v934_v46 = vsel %vm926_vm2, %v3204_v39, %v909_v10  ;;  %v933_v32 = vsel %vm926_vm2, %v909_v10, %v911_v25 }
 0x1fa   : > { %v1071_v29 = vadd.f32 %v1059_v50, %v1045_v21  ;;  %v1122_v56 = vadd.f32 %v1110_v55, %v1096_v54  ;;  %v1060_v18 = vmul.f32 %v3177_v20, %v934_v46  ;;  %v946_v47 = vmul.f32 %v3159_v59, %v934_v46 }
 0x1fb   : > { %v947_v28 = vmul.f32 %v3159_v59, %v933_v32  ;;  %v3366_v21 = vmul.f32 %v3187_v33, %v1025_v27  ;;  %v3369_v54 = vmul.f32 %v3189_v34, %v1025_v27  ;;  %v3372_v55 = vmul.f32 %v3189_v34, %v1024_v51 }
 0x1fc   : > { %v1097_v39 = vadd.f32 %v3195_v36, %v1071_v29  ;;  %v1148_v26 = vadd.f32 %v1136_v63, %v1122_v56  ;;  %v1072_v10 = vadd.f32 %v1060_v18, %v1046_v44  ;;  %v913_v50 = vpop.permute.xlu0 %912  ;;  %v3363_v57 = vpop.permute.xlu1 %920  ;;  %v1188_v44 = vmul.f32 %v3189_v34, %v1023_v3 }
 0x1fd   : > { %3926 = vst [vmem:[#allocation54_spill] sm:$0xff] %v3363_v57  ;;  %3927 = vst [vmem:[#allocation55_spill] sm:$0xff] %v3369_v54  ;;  %v932_v60 = vsel %vm926_vm2, %v911_v25, %v913_v50  ;;  %v1137_v29 = vmul.f32 %v3179_v23, %v934_v46  ;;  %v1061_v56 = vmul.f32 %v3177_v20, %v933_v32 }
 0x1fe   : > { %v1123_v36 = vadd.f32 %v1111_v61, %v1097_v39  ;;  %v1174_v63 = vadd.f32 %v3199_v37, %v1148_v26  ;;  %v1138_v18 = vmul.f32 %v3179_v23, %v933_v32  ;;  %v948_v27 = vmul.f32 %v3159_v59, %v932_v60 }
 0x1ff   : > { %v1098_v5 = vadd.f32 %v3229_v12, %v1072_v10  ;;  %v984_v22 = vadd.f32 %v3202_v38, %v946_v47  ;;  %v985_v25 = vadd.f32 %v3209_v49, %v947_v28  ;;  %v1062_v3 = vmul.f32 %v3177_v20, %v932_v60 }
 0x200   : > { %v1200_v51 = vadd.f32 %v1188_v44, %v1174_v63  ;;  %v1149_v7 = vadd.f32 %v1137_v29, %v1123_v36  ;;  %v923_v61 = vpop.permute.xlu1 %922  ;;  %v1002_v37 = vpop.permute.xlu0 %1001  ;;  %v986_v39 = vadd.f32 %v3212_v43, %v948_v27 }
 0x201   : > { %v927_v26 = vsel %vm926_vm2, %v3363_v57, %v923_v61  ;;  %v3392_v46 = vsel %vm926_vm2, %v923_v61, %v3154_v53  ;;  %v1022_v12 = vsel %vm1015_vm3, %v3260_v2, %v1002_v37  ;;  %v1021_v47 = vsel %vm1015_vm3, %v1002_v37, %v3305_v17 }
 0x202   : > { %3928 = vst [vmem:[#allocation56_spill] sm:$0xff] %v3392_v46  ;;  %v1214_v38 = vadd.f32 %v3206_v48, %v1200_v51  ;;  %v941_v49 = vmul.f32 %v3159_v59, %v927_v26  ;;  %v942_v32 = vmul.f32 %v3159_v59, %v3392_v46  ;;  %v1139_v53 = vmul.f32 %v3179_v23, %v932_v60 }
 0x203   : > { %v1056_v10 = vmul.f32 %v3177_v20, %v3392_v46  ;;  %v1175_v2 = vadd.f32 %v3234_v31, %v1149_v7  ;;  %v3411_v63 = vmul.f32 %v3177_v20, %v927_v26  ;;  %v1035_v44 = vmul.f32 %v3185_v30, %v1022_v12 }
 0x204   : > { %v2102_v28 = vmul.f32 -1.442695, %v1214_v38  ;;  %v980_v36 = vadd.f32 %v3221_v16, %v942_v32  ;;  %v915_v29 = vpop.permute.xlu1 %914  ;;  %v3414_v51 = vpop.permute.xlu0 %1013  ;;  %v3417_v43 = vmul.f32 %v3179_v23, %v927_v26  ;;  %v1036_v60 = vmul.f32 %v3185_v30, %v1021_v47 }
 0x205   : > { %3929 = vst [vmem:[#allocation57_spill] sm:$0xff] %v3411_v63  ;;  %v1112_v27 = vmul.f32 %v3187_v33, %v1022_v12  ;;  %v1189_v7 = vmul.f32 %v3189_v34, %v1022_v12  ;;  %v979_v31 = vadd.f32 %v3215_v19, %v941_v49  ;;  %v1047_v61 = vadd.f32 %v1035_v44, %v984_v22 }
 0x206   : > { %3930 = vst [vmem:[#allocation58_spill] sm:$0xff] %v3417_v43  ;;  %2337 = vpow2.f32 %v2102_v28  ;;  %v1043_v16 = vadd.f32 %v1031_v35, %v980_v36  ;;  %v1048_v37 = vadd.f32 %v1036_v60, %v985_v25  ;;  %v931_v46 = vsel %vm926_vm2, %v913_v50, %v915_v29 }
 0x207   : > { %v1124_v38 = vadd.f32 %v1112_v27, %v1098_v5  ;;  %v1201_v32 = vadd.f32 %v1189_v7, %v1175_v2  ;;  %v1073_v43 = vadd.f32 %v1061_v56, %v1047_v61  ;;  %v1113_v63 = vmul.f32 %v3187_v33, %v1021_v47 }
 0x208   : > { %v1069_v26 = vadd.f32 %v3333_v1, %v1043_v16  ;;  %v949_v54 = vmul.f32 %v3159_v59, %v931_v46  ;;  %v3428_v57 = vpop.permute.xlu0 %916  ;;  %v1190_v19 = vmul.f32 %v3189_v34, %v1021_v47  ;;  %v1063_v5 = vmul.f32 %v3177_v20, %v931_v46  ;;  %v1006_v35 = vpop.permute.xlu1 %1005 }
 0x209   : > { %v1150_v12 = vadd.f32 %v1138_v18, %v1124_v38  ;;  %v1215_v22 = vadd.f32 %v3206_v48, %v1201_v32  ;;  %v1074_v50 = vadd.f32 %v1062_v3, %v1048_v37  ;;  %v1099_v1 = vadd.f32 %v3238_v13, %v1073_v43 }
 0x20a   : > { %v1095_v25 = vadd.f32 %v3225_v4, %v1069_v26  ;;  %v3439_v56 = vsel %vm1015_vm3, %v3414_v51, %v3175_v11  ;;  %v1140_v47 = vmul.f32 %v3179_v23, %v931_v46  ;;  %v987_v3 = vadd.f32 %v3247_v41, %v949_v54 }
 0x20b   : > { %v1176_v18 = vadd.f32 %v3242_v52, %v1150_v12  ;;  %v2103_v49 = vmul.f32 -1.442695, %v1215_v22  ;;  %v1030_v2 = vmul.f32 %v3185_v30, %v3439_v56  ;;  %v1125_v4 = vadd.f32 %v1113_v63, %v1099_v1 }
 0x20c   : > { %v1121_v28 = vadd.f32 %v3366_v21, %v1095_v25  ;;  %v1020_v13 = vsel %vm1015_vm3, %v3305_v17, %v1006_v35  ;;  %v1100_v43 = vadd.f32 %v3255_v0, %v1074_v50  ;;  %v1008_v21 = vpop.permute.xlu0 %1007 }
 0x20d   : > { %v1202_v36 = vadd.f32 %v1190_v19, %v1176_v18  ;;  %2339 = vpow2.f32 %v2103_v49  ;;  %v1042_v11 = vadd.f32 %v1030_v2, %v979_v31  ;;  %v1037_v52 = vmul.f32 %v3185_v30, %v1020_v13  ;;  %v1010_v19 = vpop.permute.xlu1 %1009 }
 0x20e   : > { %v1147_v44 = vadd.f32 %v3345_v24, %v1121_v28  ;;  %v1151_v46 = vadd.f32 %v1139_v53, %v1125_v4  ;;  %v1114_v60 = vmul.f32 %v3187_v33, %v1020_v13  ;;  %v1191_v27 = vmul.f32 %v3189_v34, %v1020_v13  ;;  %v3932_v13 = vld [vmem:[#allocation55_spill] sm:$0xff] }
 0x20f   : > { %v1216_v63 = vadd.f32 %v3206_v48, %v1202_v36  ;;  %v1068_v41 = vadd.f32 %v1056_v10, %v1042_v11  ;;  %v1049_v54 = vadd.f32 %v1037_v52, %v986_v39  ;;  %v930_v24 = vsel %vm926_vm2, %v915_v29, %v3428_v57 }
 0x210   : > { %v2338_v17 = vpop.eup %2337  ;;  %v1173_v7 = vadd.f32 %v3169_v14, %v1147_v44  ;;  %v1126_v31 = vadd.f32 %v1114_v60, %v1100_v43  ;;  %v1177_v16 = vadd.f32 %v3264_v45, %v1151_v46  ;;  %v950_v32 = vmul.f32 %v3159_v59, %v930_v24 }
 0x211   : > { %v1262_v0 = vadd.f32 1.0, %v2338_v17  ;;  %v2104_v53 = vmul.f32 -1.442695, %v1216_v63  ;;  %v1094_v61 = vadd.f32 %v3251_v8, %v1068_v41  ;;  %v1075_v37 = vadd.f32 %v1063_v5, %v1049_v54  ;;  %v3934_v54 = vld [vmem:[#allocation44_spill] sm:$0xff] }
 0x212   : > { %v1199_v10 = vadd.f32 %v3372_v55, %v1173_v7  ;;  %v1152_v39 = vadd.f32 %v1140_v47, %v1126_v31  ;;  %v1203_v38 = vadd.f32 %v1191_v27, %v1177_v16  ;;  %v1064_v45 = vmul.f32 %v3177_v20, %v930_v24  ;;  %v919_v55 = vpop.permute.xlu0 %918 }
 0x213   : > { %2341 = vrcp.f32 %v1262_v0  ;;  %v1120_v14 = vadd.f32 %v3357_v62, %v1094_v61  ;;  %v1141_v26 = vmul.f32 %v3179_v23, %v930_v24  ;;  %v988_v8 = vadd.f32 %v3267_v9, %v950_v32 }
 0x214   : > { %v1213_v29 = vadd.f32 %v3206_v48, %v1199_v10  ;;  %2343 = vpow2.f32 %v2104_v53  ;;  %v1217_v12 = vadd.f32 %v3206_v48, %v1203_v38  ;;  %v1101_v5 = vadd.f32 %v3271_v42, %v1075_v37  ;;  %v3931_v42 = vld [vmem:[#allocation54_spill] sm:$0xff]  ;;  %v3935_v38 = vld [vmem:[#allocation45_spill] sm:$0xff] }
 0x215   : > { %v1146_v22 = vadd.f32 %v3342_v58, %v1120_v14  ;;  %v1178_v25 = vadd.f32 %v3277_v40, %v1152_v39  ;;  %v1019_v62 = vsel %vm1015_vm3, %v1006_v35, %v1008_v21  ;;  %v1018_v58 = vsel %vm1015_vm3, %v1008_v21, %v1010_v19  ;;  %v1012_v14 = vpop.permute.xlu1 %1011 }
 0x216   : > { %v2101_v50 = vmul.f32 -1.442695, %v1213_v29  ;;  %v2105_v1 = vmul.f32 -1.442695, %v1217_v12  ;;  %v1038_v18 = vmul.f32 %v3185_v30, %v1019_v62  ;;  %v1115_v49 = vmul.f32 %v3187_v33, %v1019_v62 }
 0x217   : > { %v2340_v47 = vpop.eup %2339  ;;  %v1172_v9 = vadd.f32 %v3173_v6, %v1146_v22  ;;  %v1192_v2 = vmul.f32 %v3189_v34, %v1019_v62  ;;  %v928_v40 = vsel %vm926_vm2, %v919_v55, %v3931_v42  ;;  %v1039_v52 = vmul.f32 %v3185_v30, %v1018_v58 }
 0x218   : > { %2345 = vpow2.f32 %v2101_v50  ;;  %v1263_v35 = vadd.f32 1.0, %v2340_v47  ;;  %v1050_v28 = vadd.f32 %v1038_v18, %v987_v3  ;;  %v1127_v4 = vadd.f32 %v1115_v49, %v1101_v5  ;;  %v3933_v3 = vld [vmem:[#allocation43_spill] sm:$0xff] }
 0x219   : > { %v1198_v36 = vadd.f32 %v3932_v13, %v1172_v9  ;;  %2347 = vpow2.f32 %v2105_v1  ;;  %v1204_v11 = vadd.f32 %v1192_v2, %v1178_v25  ;;  %v1116_v46 = vmul.f32 %v3187_v33, %v1018_v58  ;;  %v3937_v5 = vld [vmem:[#allocation51_spill] sm:$0xff] }
 0x21a   : > { %2349 = vrcp.f32 %v1263_v35  ;;  %v1076_v6 = vadd.f32 %v1064_v45, %v1050_v28  ;;  %v1153_v44 = vadd.f32 %v1141_v26, %v1127_v4  ;;  %v1051_v21 = vadd.f32 %v1039_v52, %v988_v8  ;;  %v3938_v4 = vld [vmem:[#allocation52_spill] sm:$0xff] }
 0x21b   : > { %v1212_v43 = vadd.f32 %v3206_v48, %v1198_v36  ;;  %v1218_v60 = vadd.f32 %v3206_v48, %v1204_v11  ;;  %v1193_v63 = vmul.f32 %v3189_v34, %v1018_v58  ;;  %v929_v17 = vsel %vm926_vm2, %v3428_v57, %v919_v55  ;;  %v3939_v36 = vld [vmem:[#allocation31_spill] sm:$0xff] }
 0x21c   : > { %v1102_v41 = vadd.f32 %v3933_v3, %v1076_v6  ;;  %v1179_v27 = vadd.f32 %v3934_v54, %v1153_v44  ;;  %v952_v7 = vmul.f32 %v3159_v59, %v928_v40  ;;  %v951_v0 = vmul.f32 %v3159_v59, %v929_v17  ;;  %v3936_v59 = vld [vmem:[#allocation46_spill] sm:$0xff]  ;;  %v3941_v6 = vld [vmem:[#allocation57_spill] sm:$0xff]  ;;  %v3943_v3 = vld [vmem:[#allocation47_spill] sm:$0xff] }
 0x21d   : > { %v2342_v31 = vpop.eup %2341  ;;  %v2100_v16 = vmul.f32 -1.442695, %v1212_v43  ;;  %v2106_v24 = vmul.f32 -1.442695, %v1218_v60  ;;  %v1065_v53 = vmul.f32 %v3177_v20, %v929_v17  ;;  %v1119_v37 = vmul.f32 %v3187_v33, %v3439_v56  ;;  %v3942_v60 = vld [vmem:[#allocation29_spill] sm:$0xff]  ;;  %v3944_v54 = vld [vmem:[#allocation48_spill] sm:$0xff] }
 0x21e   : > { %v2344_v61 = vpop.eup %2343  ;;  %v1128_v10 = vadd.f32 %v1116_v46, %v1102_v41  ;;  %v1205_v39 = vadd.f32 %v1193_v63, %v1179_v27  ;;  %v990_v32 = vadd.f32 %v3935_v38, %v952_v7  ;;  %v1066_v57 = vmul.f32 %v3177_v20, %v928_v40  ;;  %v3948_v38 = vld [vmem:[#allocation56_spill] sm:$0xff] }
 0x21f   : > { %v1264_v45 = vadd.f32 1.0, %v2344_v61  ;;  %2351 = vpow2.f32 %v2100_v16  ;;  %v1077_v26 = vadd.f32 %v1065_v53, %v1051_v21  ;;  %v989_v12 = vadd.f32 %v3936_v59, %v951_v0  ;;  %v3946_v0 = vld [vmem:[#allocation21_spill] sm:$0xff]  ;;  %v3947_v61 = vld [vmem:[#allocation23_spill] sm:$0xff] }
 0x220   : > { %2353 = vpow2.f32 %v2106_v24  ;;  %v1219_v29 = vadd.f32 %v3206_v48, %v1205_v39  ;;  %v1142_v8 = vmul.f32 %v3179_v23, %v929_v17  ;;  %v1016_v55 = vsel %vm1015_vm3, %v1012_v14, %v3414_v51 }
 0x221   : > { %2355 = vrcp.f32 %v1264_v45  ;;  %v1017_v22 = vsel %vm1015_vm3, %v1010_v19, %v1012_v14  ;;  %v1103_v25 = vadd.f32 %v3937_v5, %v1077_v26  ;;  %v1041_v18 = vmul.f32 %v3185_v30, %v1016_v55 }
 0x222   : > { %v2346_v62 = vpop.eup %2345  ;;  %v2107_v20 = vmul.f32 -1.442695, %v1219_v29  ;;  %v1154_v50 = vadd.f32 %v1142_v8, %v1128_v10  ;;  %v1040_v1 = vmul.f32 %v3185_v30, %v1017_v22  ;;  %v1143_v47 = vmul.f32 %v3179_v23, %v928_v40  ;;  %v3940_v30 = vld [vmem:[#allocation33_spill] sm:$0xff] }
 0x223   : > { %v2348_v49 = vpop.eup %2347  ;;  %v1117_v9 = vmul.f32 %v3187_v33, %v1017_v22  ;;  %v1118_v2 = vmul.f32 %v3187_v33, %v1016_v55  ;;  %v1194_v51 = vmul.f32 %v3189_v34, %v1017_v22  ;;  %v1053_v35 = vadd.f32 %v1041_v18, %v990_v32  ;;  %v3952_v18 = vld [vmem:[#allocation50_spill] sm:$0xff] }
 0x224   : > { %v2350_v58 = vpop.eup %2349  ;;  %v1265_v19 = vadd.f32 1.0, %v2348_v49  ;;  %2357 = vpow2.f32 %v2107_v20  ;;  %v1052_v42 = vadd.f32 %v1040_v1, %v989_v12  ;;  %v1180_v13 = vadd.f32 %v3938_v4, %v1154_v50  ;;  %v3951_v20 = vld [vmem:[#allocation53_spill] sm:$0xff] }
 0x225   : > { %v1129_v28 = vadd.f32 %v1117_v9, %v1103_v25  ;;  %v1298_v11 = vmul.f32 %v2342_v31, %v3939_v36  ;;  %v1299_v52 = vmul.f32 %v2350_v58, %v3940_v30  ;;  %v1079_v44 = vadd.f32 %v3941_v6, %v1053_v35  ;;  %v3945_v31 = vld [vmem:[#allocation49_spill] sm:$0xff]  ;;  %v3950_v25 = vld [vmem:[#allocation34_spill] sm:$0xff] }
 0x226   : > { %2359 = vrcp.f32 %v1265_v19  ;;  %v1078_v40 = vadd.f32 %v1066_v57, %v1052_v42  ;;  %v1261_v46 = vadd.f32 1.0, %v2346_v62  ;;  %v1206_v43 = vadd.f32 %v1194_v51, %v1180_v13 }
 0x227   : > { %v1155_v33 = vadd.f32 %v1143_v47, %v1129_v28  ;;  %v1319_v21 = vrot.slane %v1298_v11, %v3942_v60  ;;  %v1323_v63 = vrot.slane %v1299_v52, %v3942_v60  ;;  %v1105_v27 = vadd.f32 %v3944_v54, %v1079_v44  ;;  %v3953_v47 = vld [vmem:[#allocation42_spill] sm:$0xff]  ;;  %v3954_v28 = vld [vmem:[#allocation24_spill] sm:$0xff] }
 0x228   : > { %v1104_v41 = vadd.f32 %v3943_v3, %v1078_v40  ;;  %v1195_v17 = vmul.f32 %v3189_v34, %v1016_v55  ;;  %2361 = vrcp.f32 %v1261_v46  ;;  %v1220_v24 = vadd.f32 %v3206_v48, %v1206_v43  ;;  %v3949_v55 = vld [vmem:[#allocation58_spill] sm:$0xff]  ;;  %v3956_v52 = vld [vmem:[#allocation32_spill] sm:$0xff]  ;;  %v3957_v46 = vld [vmem:[#allocation25_spill] sm:$0xff] }
 0x229   : > { %v2352_v7 = vpop.eup %2351  ;;  %v1181_v16 = vadd.f32 %v3945_v31, %v1155_v33  ;;  %v3529_v53 = vadd.f32 %v1319_v21, %v3946_v0  ;;  %v3532_v10 = vadd.f32 %v1323_v63, %v3947_v61  ;;  %v1145_v32 = vmul.f32 %v3179_v23, %v3948_v38  ;;  %v3958_v63 = vld [vmem:[#allocation30_spill] sm:$0xff]  ;;  %v2417_v0 = vld [vmem:[%s2912_s10] sm:$0xff] }
 0x22a   : > { %v2354_v39 = vpop.eup %2353  ;;  %v1130_v14 = vadd.f32 %v1118_v2, %v1104_v41  ;;  %v1131_v45 = vadd.f32 %v1119_v37, %v1105_v27  ;;  %v1260_v57 = vadd.f32 1.0, %v2352_v7  ;;  %v2108_v12 = vmul.f32 -1.442695, %v1220_v24  ;;  %v3959_v27 = vld [vmem:[#allocation35_spill] sm:$0xff] }
 0x22b   : > { %v2356_v26 = vpop.eup %2355  ;;  %v1266_v29 = vadd.f32 1.0, %v2354_v39  ;;  %v1207_v59 = vadd.f32 %v1195_v17, %v1181_v16  ;;  %v2300_v8 = vpack.i.bf16 %v3532_v10, %v3529_v53  ;;  %v1197_v50 = vmul.f32 %v3189_v34, %v3951_v20  ;;  %v3960_v39 = vld [vmem:[#allocation22_spill] sm:$0xff] }
 0x22c   : > { %v1156_v22 = vadd.f32 %v3949_v55, %v1130_v14  ;;  %v1157_v5 = vadd.f32 %v1145_v32, %v1131_v45  ;;  %v1300_v62 = vmul.f32 %v2356_v26, %v3950_v25  ;;  %2363 = vrcp.f32 %v1260_v57  ;;  %v2418_v14 = vld [vmem:[%s2912_s10 + $0x18] sm:$0xff]  ;;  %v3961_v57 = vld [vmem:[#allocation39_spill] sm:$0xff] }
 0x22d   : > { %v1196_v23 = vmul.f32 %v3189_v34, %v3439_v56  ;;  %2365 = vrcp.f32 %v1266_v29  ;;  %v1221_v37 = vadd.f32 %v3206_v48, %v1207_v59  ;;  %2301 = vrot.lane.b32.xlu0 %v2300_v8, %s2633_s29  ;;  %v3955_v56 = vld [vmem:[#allocation36_spill] sm:$0xff] }
 0x22e   : > { %v2358_v1 = vpop.eup %2357  ;;  %v1182_v49 = vadd.f32 %v3952_v18, %v1156_v22  ;;  %v1183_v9 = vadd.f32 %v3953_v47, %v1157_v5  ;;  %2367 = vpow2.f32 %v2108_v12  ;;  %v1327_v2 = vrot.slane %v1300_v62, %v3942_v60  ;;  %v3962_v22 = vld [vmem:[#allocation26_spill] sm:$0xff] }
 0x22f   : > { %v1267_v51 = vadd.f32 1.0, %v2358_v1  ;;  %v2109_v58 = vmul.f32 -1.442695, %v1221_v37  ;;  %v3963_v37 = vld [vmem:[#allocation40_spill] sm:$0xff] }
 0x230   : > { %v2360_v19 = vpop.eup %2359  ;;  %v1208_v42 = vadd.f32 %v1196_v23, %v1182_v49  ;;  %v1209_v35 = vadd.f32 %v1197_v50, %v1183_v9  ;;  %v3550_v34 = vadd.f32 %v1327_v2, %v3954_v28  ;;  %v3964_v49 = vld [vmem:[#allocation41_spill] sm:$0xff] }
 0x231   : > { %2369 = vrcp.f32 %v1267_v51  ;;  %1410 = vrot.lane.b32.xlu0 %v3532_v10, %s2634_s18  ;;  %v1301_v4 = vmul.f32 %v2360_v19, %v3955_v56  ;;  %v3966_v28 = vld [vmem:[#allocation37_spill] sm:$0xff] }
 0x232   : > { %v2362_v13 = vpop.eup %2361  ;;  %v1222_v36 = vadd.f32 %v3206_v48, %v1208_v42  ;;  %v1223_v11 = vadd.f32 %v3206_v48, %v1209_v35  ;;  %2371 = vpow2.f32 %v2109_v58  ;;  %1412 = vrot.lane.b32.xlu1 %v3550_v34, %s2634_s18  ;;  %v2419_v58 = vld [vmem:[%s2912_s10 + $0x20] sm:$0xff]  ;;  %v3965_v42 = vld [vmem:[#allocation28_spill] sm:$0xff] }
 0x233   : > { %v1331_v30 = vrot.slane %v1301_v4, %v3942_v60  ;;  %v1297_v40 = vmul.f32 %v2362_v13, %v3956_v52  ;;  %v3967_v52 = vld [vmem:[#allocation38_spill] sm:$0xff] }
 0x234   : > { %v2110_v6 = vmul.f32 -1.442695, %v1222_v36  ;;  %v2111_v44 = vmul.f32 -1.442695, %v1223_v11  ;;  %v2420_v11 = vld [vmem:[%s2912_s10 + $0x28] sm:$0xff] }
 0x235   : > { %v3562_v33 = vadd.f32 %v1331_v30, %v3957_v46  ;;  %v1315_v41 = vrot.slane %v1297_v40, %v3942_v60  ;;  %v2635_v46 = vmov 0  }
 0x236   : > { %v2364_v43 = vpop.eup %2363  ;;  %2373 = vpow2.f32 %v2110_v6  ;;  %2330 = vset.pattern.permute.xlu0 %v2635_v46 }
 0x237   : > { %v2366_v21 = vpop.eup %2365  ;;  %2375 = vpow2.f32 %v2111_v44  ;;  %1414 = vrot.lane.b32.xlu0 %v3562_v33, %s2634_s18  ;;  %v2305_v48 = vpack.i.bf16 %v3562_v33, %v3550_v34  ;;  %v1296_v3 = vmul.f32 %v2364_v43, %v3958_v63  ;;  %v3576_v38 = vadd.f32 %v1315_v41, %v3960_v39  ;;  %v1543_v44 = vld [vmem:[%s3820_s3] sm:$0xf]  ;;  %v3968_v43 = vld [vmem:[#allocation27_spill] sm:$0xff] }
 0x238   : > { %v2368_v54 = vpop.eup %2367  ;;  %v1302_v17 = vmul.f32 %v2366_v21, %v3959_v27  ;;  %v1449_v39 = vrot.slane %v3550_v34, 4 }
 0x239   : > { %v1268_v7 = vadd.f32 1.0, %v2368_v54  ;;  %2306 = vrot.lane.b32.xlu1 %v2305_v48, %s2633_s29  ;;  %v1311_v31 = vrot.slane %v1296_v3, %v3942_v60  ;;  %v2320_v55 = vpack.i.bf16 %v3576_v38, %v3529_v53 }
 0x23a   : > { %v1335_v16 = vrot.slane %v1302_v17, %v3942_v60 }
 0x23b   : > { %v2370_v24 = vpop.eup %2369  ;;  %2377 = vrcp.f32 %v1268_v7  ;;  %v1362_v61 = vadd.f32 %v2417_v0, %v1311_v31 }
 0x23c   : > { %v2372_v32 = vpop.eup %2371  ;;  %v3579_v45 = vadd.f32 %v2418_v14, %v1335_v16  ;;  %v1303_v26 = vmul.f32 %v2370_v24, %v3961_v57 }
 0x23d   : > { %v1269_v29 = vadd.f32 1.0, %v2372_v32  ;;  %v2310_v59 = vpack.i.bf16 %v1362_v61, %v3576_v38 }
 0x23e   : > { %1416 = vrot.lane.b32.xlu1 %v3579_v45, %s2634_s18  ;;  %v1339_v12 = vrot.slane %v1303_v26, %v3942_v60  ;;  %v1448_v26 = vrot.slane %v3532_v10, 4 }
 0x23f   : > { %2379 = vrcp.f32 %v1269_v29  ;;  %2311 = vrot.lane.b32.xlu0 %v2310_v59, %s2633_s29 }
 0x240   : > { %v2374_v8 = vpop.eup %2373  ;;  %v3590_v5 = vadd.f32 %v1339_v12, %v3962_v22 }
 0x241   : > { %v2376_v25 = vpop.eup %2375  ;;  %v1270_v62 = vadd.f32 1.0, %v2374_v8 }
 0x242   : > { %2321 = vrot.lane.b32.xlu1 %v2320_v55, %s2634_s18  ;;  %v2315_v20 = vpack.i.bf16 %v3590_v5, %v3579_v45  ;;  %v1271_v50 = vadd.f32 1.0, %v2376_v25  ;;  %v1447_v55 = vrot.slane %v3529_v53, 4 }
 0x243   : > { %2381 = vrcp.f32 %v1270_v62 }
 0x244   : > { %2316 = vrot.lane.b32.xlu0 %v2315_v20, %s2633_s29  ;;  %2383 = vrcp.f32 %v1271_v50 }
 0x245   : > { %v2378_v23 = vpop.eup %2377 }
 0x246   : > { %v1304_v1 = vmul.f32 %v2378_v23, %v3963_v37  ;;  %v1446_v37 = vrot.slane %v3576_v38, 4 }
 0x248   : > { %1418 = vrot.lane.b32.xlu0 %v3590_v5, %s2634_s18  ;;  %v1343_v9 = vrot.slane %v1304_v1, %v3942_v60  ;;  %v1450_v1 = vrot.slane %v3562_v33, 4 }
 0x249   : > { %v2380_v18 = vpop.eup %2379 }
 0x24a   : > { %v1305_v47 = vmul.f32 %v2380_v18, %v3964_v49  ;;  %v3603_v19 = vadd.f32 %v2419_v58, %v1343_v9 }
 0x24c   : > { %v1347_v2 = vrot.slane %v1305_v47, %v3942_v60 }
 0x24d   : > { %v2382_v51 = vpop.eup %2381 }
 0x24e   : > { %v3606_v35 = vadd.f32 %v1347_v2, %v3965_v42  ;;  %v1306_v56 = vmul.f32 %v2382_v51, %v3966_v28  ;;  %v2384_v36 = vpop.eup %2383  ;;  %v1451_v2 = vrot.slane %v3579_v45, 4 }
 0x24f   : > { %v1307_v40 = vmul.f32 %v2384_v36, %v3967_v52 }
 0x250   : > { %v2325_v4 = vpack.i.bf16 %v3606_v35, %v3603_v19  ;;  %1422 = vrot.lane.b32.xlu0 %v3606_v35, %s2634_s18  ;;  %v1351_v13 = vrot.slane %v1306_v56, %v3942_v60 }
 0x251   : > { %v1355_v6 = vrot.slane %v1307_v40, %v3942_v60 }
 0x252   : > { %2326 = vrot.lane.b32.xlu1 %v2325_v4, %s2633_s29  ;;  %v3616_v30 = vadd.f32 %v2420_v11, %v1351_v13 }
 0x253   : > { %v1373_v21 = vadd.f32 %v1355_v6, %v3968_v43 }
 0x254   : > { %1394 = vrot.lane.b32.xlu0 %v3616_v30, %s2633_s29  ;;  %s2133_s29 = sshll.u32 %s2610_s24, 3  ;;  %s1923_s24 = scalar_lea.sflag [#allocation4], %s2908_s23 }
 0x256   : > { %1420 = vrot.lane.b32.xlu1 %v3603_v19, %s2634_s18 }
 0x258   : > { %1546 = vperm.xlu0 %2330, %v1543_v44  }
 0x25a   : > { %1424 = vrot.lane.b32.xlu1 %v3616_v30, %s2634_s18 }
 0x25e   : > { %1426 = vrot.lane.b32.xlu1 %v1373_v21, %s2634_s18  ;;  %s2134_s18 = sshll.u32 %s2614_s25, 4  ;;  %s2496_s25 = scalar_lea.vmem %s3756_s12, 512 }
 0x25f   : > { %s1935_s21 = sadd.s32 %s2134_s18, %s2133_s29  ;;  %p2497_p11 = scmp.ne.s32.totalorder %s3756_s12, %s2496_s25 }
 0x260   : > { %s2135_s0 = sshll.u32 %s1935_s21, 6  ;;  %p2504_p7 = scmp.lt.s32.totalorder %s2502_s1, %s2496_s25 }
 0x261   : > { %s3754_s17 = scalar_lea.hbm %s3970_s7, %s2135_s0  ;;  %p2498_p8 = pnand %p2497_p11, %p3971_p0 }
 0x262   : > { %p2505_p1 = por %p2504_p7, %p2503_p5 }
 0x263   : > { %p2499_p10 = pneg %p2498_p8 }
 0x265   : > { %p2506_p3 = pnand %p2505_p1, %p2499_p10 }
 0x29f   : > { %v2302_v48 = vpop.permute.xlu0 %2301 }
 0x2a0   : > { %v2304_v41 = vunpack.i.h.bf16 %v2302_v48  ;;  %v2303_v54 = vunpack.i.l.bf16 %v2302_v48 }
 0x2a2   : > { %v1403_v24 = vsel %vm926_vm2, %v2303_v54, %v2304_v41 }
 0x2a3   : > { %v1411_v3 = vpop.permute.xlu0 %1410  ;;  %v1518_v20 = vsel %vm335_vm0, %v1403_v24, %v1448_v26  ;;  %v1471_v18 = vrot.slane %v1403_v24, 4 }
 0x2a4   : > { %v1413_v63 = vpop.permute.xlu1 %1412 }
 0x2a5   : > { %v3640_v32 = vsel %vm1015_vm3, %v1411_v3, %v1413_v63 }
 0x2a6   : > { %v1495_v49 = vrot.slane %v3640_v32, 4 }
 0x2a9   : > { %v1415_v7 = vpop.permute.xlu0 %1414 }
 0x2aa   : > { %v3644_v14 = vsel %vm1015_vm3, %v1413_v63, %v1415_v7 }
 0x2ab   : > { %v2307_v60 = vpop.permute.xlu1 %2306  ;;  %v1496_v51 = vrot.slane %v3644_v14, 4 }
 0x2ac   : > { %v2309_v27 = vunpack.i.h.bf16 %v2307_v60  ;;  %v2308_v17 = vunpack.i.l.bf16 %v2307_v60 }
 0x2ae   : > { %v1401_v31 = vsel %vm926_vm2, %v2308_v17, %v2309_v27  ;;  %v1402_v16 = vsel %vm926_vm2, %v2304_v41, %v2308_v17 }
 0x2af   : > { %v1472_v0 = vrot.slane %v1402_v16, 4  ;;  %v1473_v61 = vrot.slane %v1401_v31, 4  ;;  %v1519_v59 = vsel %vm335_vm0, %v1402_v16, %v1449_v39  ;;  %v1520_v36 = vsel %vm335_vm0, %v1401_v31, %v1450_v1 }
 0x2b0   : > { %v1417_v57 = vpop.permute.xlu1 %1416  ;;  %v1534_v16 = vsel %vm335_vm0, %v3550_v34, %v1496_v51 }
 0x2b1   : > { %v2312_v29 = vpop.permute.xlu0 %2311  ;;  %v1527_v12 = vsel %vm335_vm0, %v3644_v14, %v1473_v61  ;;  %v1526_v8 = vsel %vm335_vm0, %v3640_v32, %v1472_v0  ;;  %v1433_v50 = vsel %vm1015_vm3, %v1415_v7, %v1417_v57  ;;  %v1533_v7 = vsel %vm335_vm0, %v3532_v10, %v1495_v49 }
 0x2b2   : > { %v2314_v22 = vunpack.i.h.bf16 %v2312_v29  ;;  %v2313_v25 = vunpack.i.l.bf16 %v2312_v29  ;;  %v2146_v62 = vpack.c.bf16 %v1527_v12, %v1519_v59  ;;  %v2148_v23 = vpack.c.bf16 %v1526_v8, %v1518_v20 }
 0x2b3   : > { %v1497_v56 = vrot.slane %v1433_v50, 4  ;;  %v2142_v24 = vpack.c.bf16 %v1519_v59, %v1533_v7  ;;  %v2152_v61 = vpack.c.bf16 %v1520_v36, %v1534_v16  ;;  %v3969_v8 = vmov 0.0  }
 0x2b4   : > { %v1404_v47 = vsel %vm926_vm2, %v2313_v25, %v2303_v54  ;;  %v2322_v9 = vpop.permute.xlu1 %2321  ;;  %2147 = vmatprep.subr.bf16.mxu1 %v2146_v62  ;;  %v1405_v58 = vsel %vm926_vm2, %v2314_v22, %v2313_v25 }
 0x2b5   : > { %v2324_v42 = vunpack.i.h.bf16 %v2322_v9  ;;  %v2323_v28 = vunpack.i.l.bf16 %v2322_v9  ;;  %2149 = vmatpush1.bf16.msra.mxu1 %v2148_v23  ;;  %v1470_v38 = vrot.slane %v1404_v47, 4  ;;  %v1517_v13 = vsel %vm335_vm0, %v1404_v47, %v1447_v55 }
 0x2b6   : > { %v2317_v4 = vpop.permute.xlu0 %2316  ;;  %v1516_v43 = vsel %vm335_vm0, %v1405_v58, %v1446_v37  ;;  %v1535_v17 = vsel %vm335_vm0, %v3562_v33, %v1497_v56  ;;  %v1453_v37 = vrot.slane %v3603_v19, 4 }
 0x2b7   : > { %v2319_v11 = vunpack.i.h.bf16 %v2317_v4  ;;  %v2318_v52 = vunpack.i.l.bf16 %v2317_v4  ;;  %v1436_v40 = vsel %vm1015_vm3, %v2323_v28, %v1411_v3  ;;  %v1437_v6 = vsel %vm1015_vm3, %v2324_v42, %v2323_v28 }
 0x2b8   : > { %v1494_v44 = vrot.slane %v1436_v40, 4  ;;  %v1525_v46 = vsel %vm335_vm0, %v1436_v40, %v1471_v18  ;;  %v1524_v21 = vsel %vm335_vm0, %v1437_v6, %v1470_v38  ;;  %v1513_v6 = vrot.slane %v3616_v30, 4 }
 0x2b9   : > { %v1399_v48 = vsel %vm926_vm2, %v2318_v52, %v2319_v11  ;;  %v1400_v63 = vsel %vm926_vm2, %v2309_v27, %v2318_v52  ;;  %v2138_v41 = vpack.c.bf16 %v1525_v46, %v1517_v13  ;;  %v2140_v54 = vpack.c.bf16 %v1524_v21, %v1516_v43 }
 0x2ba   : > { %v1419_v60 = vpop.permute.xlu0 %1418  ;;  %v1521_v3 = vsel %vm335_vm0, %v1400_v63, %v1451_v2  ;;  %v1532_v27 = vsel %vm335_vm0, %v3529_v53, %v1494_v44  ;;  %v1475_v0 = vrot.slane %v1399_v48, 4  ;;  %v1474_v39 = vrot.slane %v1400_v63, 4  ;;  %v3694_v53 = vld [vmem:[%s3819_s2] sm:$0xf] }
 0x2bb   : > { %2139 = vmatprep.subr.bf16.mxu0 %v2138_v41  ;;  %v2150_v31 = vpack.c.bf16 %v1521_v3, %v1535_v17  ;;  %v1432_v26 = vsel %vm1015_vm3, %v1417_v57, %v1419_v60  ;;  %v2144_v10 = vpack.c.bf16 %v1518_v20, %v1532_v27 }
 0x2bc   : > { %2141 = vmatpush1.bf16.msra.mxu0 %v2140_v54  ;;  %v1529_v33 = vsel %vm335_vm0, %v1432_v26, %v1475_v0  ;;  %v1528_v34 = vsel %vm335_vm0, %v1433_v50, %v1474_v39 }
 0x2bd   : > { %2151 = vmatprep.subr.bf16.mxu1 %v2150_v31  ;;  %2143 = vmatprep.subr.bf16.mxu0 %v2142_v24  ;;  %v2154_v57 = vpack.c.bf16 %v1529_v33, %v1521_v3  ;;  %v2156_v12 = vpack.c.bf16 %v1528_v34, %v1520_v36 }
 0x2be   : > { %2153 = vmatpush1.bf16.msra.mxu1 %v2152_v61 }
 0x2bf   : > { %2115 = vmatprep.subr.msk.mxu1 %vm335_vm0, %v1432_v26 }
 0x2c0   : > { %2145 = vmatpush1.bf16.msra.mxu0 %v2144_v10 }
 0x2c1   : > { %2112 = vmatprep.subr.msk.mxu0 %vm335_vm0, %v3644_v14  ;;  %v1498_v14 = vrot.slane %v1432_v26, 4 }
 0x2c2   : > { %2116 = vmatpush1.msk.msra.mxu1 %vm335_vm0, %v1433_v50  ;;  %v1423_v59 = vpop.permute.xlu0 %1422 }
 0x2c3   : > { %2117 = vmatmul.mubr.msk.f32.vlgmr.msra.gmra.mrb[6].mxu1 %vm1549_vm4, %v3694_v53  ;;  %v1536_v42 = vsel %vm335_vm0, %v3579_v45, %v1498_v14  ;;  %v1512_v45 = vrot.slane %v3606_v35, 4 }
 0x2c4   : > { %v2327_v29 = vpop.permute.xlu1 %2326  ;;  %2113 = vmatpush1.msk.msra.mxu0 %vm335_vm0, %v3640_v32  ;;  %1847 = vmatprep.mubr.f32.mxu1 %v3969_v8  ;;  %v1452_v32 = vrot.slane %v3590_v5, 4 }
 0x2c5   : > { %v2329_v55 = vunpack.i.h.bf16 %v2327_v29  ;;  %v2328_v22 = vunpack.i.l.bf16 %v2327_v29  ;;  %2114 = vmatmul.mubr.msk.f32.vlgmr.msra.gmra.mrb[6].mxu0 %vm1549_vm4, %v3694_v53  ;;  %2155 = vmatprep.subr.bf16.mxu0 %v2154_v57 }
 0x2c6   : > { %2157 = vmatpush1.bf16.msra.mxu0 %v2156_v12  ;;  %1776 = vmatprep.mubr.f32.mxu0 %v3969_v8  ;;  %v1522_v1 = vsel %vm335_vm0, %v1399_v48, %v1452_v32  ;;  %v1395_v51 = vpop.permute.xlu0 %1394 }
 0x2c7   : > { %v1397_v25 = vsel %vm926_vm2, %v2328_v22, %v2329_v55  ;;  %v1398_v62 = vsel %vm926_vm2, %v2319_v11, %v2328_v22  ;;  %v1396_v36 = vsel %vm926_vm2, %v2329_v55, %v1395_v51  ;;  %v2160_v40 = vpack.c.bf16 %v1522_v1, %v1536_v42 }
 0x2c8   : > { %v1476_v20 = vrot.slane %v1398_v62, 4  ;;  %v1477_v50 = vrot.slane %v1397_v25, 4  ;;  %v1421_v23 = vpop.permute.xlu1 %1420  ;;  %v1523_v58 = vsel %vm335_vm0, %v1398_v62, %v1453_v37  ;;  %v1540_v63 = vsel %vm335_vm0, %v1397_v25, %v1512_v45 }
 0x2c9   : > { %v1430_v18 = vsel %vm1015_vm3, %v1421_v23, %v1423_v59  ;;  %v1431_v49 = vsel %vm1015_vm3, %v1419_v60, %v1421_v23 }
 0x2ca   : > { %v1499_v47 = vrot.slane %v1431_v49, 4  ;;  %v1530_v9 = vsel %vm335_vm0, %v1431_v49, %v1476_v20  ;;  %v1531_v2 = vsel %vm335_vm0, %v1430_v18, %v1477_v50  ;;  %v1500_v28 = vrot.slane %v1430_v18, 4 }
 0x2cb   : > { %v2164_v38 = vpack.c.bf16 %v1530_v9, %v1522_v1  ;;  %v2162_v56 = vpack.c.bf16 %v1531_v2, %v1523_v58 }
 0x2cc   : > { %v1425_v4 = vpop.permute.xlu1 %1424  ;;  %v1537_v13 = vsel %vm335_vm0, %v3590_v5, %v1499_v47  ;;  %v1538_v46 = vsel %vm335_vm0, %v3603_v19, %v1500_v28  ;;  %v1541_v5 = vsel %vm335_vm0, %v1396_v36, %v1513_v6 }
 0x2cd   : > { %v1429_v11 = vsel %vm1015_vm3, %v1423_v59, %v1425_v4  ;;  %2163 = vmatprep.subr.bf16.mxu1 %v2162_v56  ;;  %v2158_v52 = vpack.c.bf16 %v1523_v58, %v1537_v13  ;;  %v2168_v30 = vpack.c.bf16 %v1540_v63, %v1538_v46 }
 0x2ce   : > { %v1501_v44 = vrot.slane %v1429_v11, 4  ;;  %2165 = vmatpush1.bf16.msra.mxu1 %v2164_v38 }
 0x2cf   : > { %2159 = vmatprep.subr.bf16.mxu0 %v2158_v52 }
 0x2d0   : > { %v1539_v43 = vsel %vm335_vm0, %v3606_v35, %v1501_v44  ;;  %2161 = vmatpush1.bf16.msra.mxu0 %v2160_v40  ;;  %v1427_v21 = vpop.permute.xlu1 %1426 }
 0x2d1   : > { %v2166_v48 = vpack.c.bf16 %v1541_v5, %v1539_v43  ;;  %2118 = vmatprep.subr.msk.mxu0 %vm335_vm0, %v1430_v18  ;;  %v1428_v41 = vsel %vm1015_vm3, %v1425_v4, %v1427_v21 }
 0x2d3   : > { %2167 = vmatprep.subr.bf16.mxu1 %v2166_v48 }
 0x2d4   : > { %2169 = vmatpush1.bf16.msra.mxu1 %v2168_v30  ;;  %2119 = vmatpush1.msk.msra.mxu0 %vm335_vm0, %v1431_v49 }
 0x2d5   : > { %2121 = vmatprep.subr.msk.mxu1 %vm335_vm0, %v1428_v41  ;;  %2120 = vmatmul.mubr.msk.f32.vlgmr.msra.gmra.mrb[8].mxu0 %vm1549_vm4, %v3694_v53 }
 0x2d7   : > { %v1547_v19 = vpop.permute.xlu0 %1546 }
 0x2d8   : > { %2122 = vmatpush1.msk.msra.mxu1 %vm335_vm0, %v1429_v11 }
 0x2d9   : > { %2123 = vmatmul.mubr.msk.f32.vlgmr.msra.gmra.mrb[8].mxu1 %vm1549_vm4, %v3694_v53 }
 0x396   : > { %v1707_v35 = vpop.f32.mrb[6].mxu1 }
 0x397   : > { %v1709_v54 = vpop.f32.mrb[7].mxu1  ;;  %v1708_v60 = vadd.f32 %v1707_v35, %v1547_v19 }
 0x398   : > { %v1636_v3 = vpop.f32.mrb[6].mxu0  ;;  %v1710_v15 = vadd.f32 %v1709_v54, %v1547_v19 }
 0x399   : > { %v1638_v17 = vpop.f32.mrb[7].mxu0  ;;  %v1637_v7 = vadd.f32 %v1636_v3, %v1547_v19  ;;  %v2126_v31 = vmul.f32 -1.442695, %v1708_v60 }
 0x39a   : > { %v1639_v16 = vadd.f32 %v1638_v17, %v1547_v19  ;;  %v2127_v24 = vmul.f32 -1.442695, %v1710_v15 }
 0x39b   : > { %v2124_v27 = vmul.f32 -1.442695, %v1637_v7  ;;  %2385 = vpow2.f32 %v2126_v31 }
 0x39c   : > { %v2125_v0 = vmul.f32 -1.442695, %v1639_v16  ;;  %2387 = vpow2.f32 %v2127_v24 }
 0x39d   : > { %2389 = vpow2.f32 %v2124_v27 }
 0x39e   : > { %2391 = vpow2.f32 %v2125_v0 }
 0x3a5   : > { %v2386_v61 = vpop.eup %2385 }
 0x3a6   : > { %v2388_v39 = vpop.eup %2387  ;;  %v1880_v26 = vadd.f32 1.0, %v2386_v61 }
 0x3a7   : > { %v2390_v10 = vpop.eup %2389  ;;  %v1881_v33 = vadd.f32 1.0, %v2388_v39 }
 0x3a8   : > { %v2392_v53 = vpop.eup %2391  ;;  %v1878_v34 = vadd.f32 1.0, %v2390_v10  ;;  %2393 = vrcp.f32 %v1880_v26  ;;  %v1778_v57 = vpop.f32.mrb[8].mxu0 }
 0x3a9   : > { %v1879_v29 = vadd.f32 1.0, %v2392_v53  ;;  %2395 = vrcp.f32 %v1881_v33  ;;  %v1779_v59 = vadd.f32 %v1778_v57, %v1547_v19  ;;  %v1780_v12 = vpop.f32.mrb[9].mxu0 }
 0x3aa   : > { %2397 = vrcp.f32 %v1878_v34  ;;  %v1781_v8 = vadd.f32 %v1780_v12, %v1547_v19 }
 0x3ab   : > { %2399 = vrcp.f32 %v1879_v29  ;;  %v2128_v55 = vmul.f32 -1.442695, %v1779_v59 }
 0x3ac   : > { %v1849_v22 = vpop.f32.mrb[8].mxu1  ;;  %v2129_v14 = vmul.f32 -1.442695, %v1781_v8 }
 0x3ad   : > { %2401 = vpow2.f32 %v2128_v55  ;;  %v1850_v25 = vadd.f32 %v1849_v22, %v1547_v19  ;;  %v1851_v62 = vpop.f32.mrb[9].mxu1 }
 0x3ae   : > { %2403 = vpow2.f32 %v2129_v14  ;;  %v1852_v32 = vadd.f32 %v1851_v62, %v1547_v19 }
 0x3af   : > { %v2130_v20 = vmul.f32 -1.442695, %v1850_v25 }
 0x3b0   : > { %v2131_v50 = vmul.f32 -1.442695, %v1852_v32 }
 0x3b1   : > { %2405 = vpow2.f32 %v2130_v20 }
 0x3b2   : > { %v2394_v23 = vpop.eup %2393  ;;  %2407 = vpow2.f32 %v2131_v50 }
 0x3b3   : > { %v2396_v37 = vpop.eup %2395 }
 0x3b4   : > { %v2398_v1 = vpop.eup %2397  ;;  %v1911_v18 = vcombine.low %v2394_v23, %v2396_v37 }
 0x3b5   : > { %v2400_v49 = vpop.eup %2399 }
 0x3b6   : > { %v1910_v47 = vcombine.low %v2398_v1, %v2400_v49  ;;  %1919 = vst [vmem:[%s310_s9 + $0x8] sm:$0xff] %v1911_v18 }
 0x3b7   : > { %v2402_v9 = vpop.eup %2401 }
 0x3b8   : > { %v2404_v2 = vpop.eup %2403  ;;  %v1882_v51 = vadd.f32 1.0, %v2402_v9  ;;  %1918 = vst [vmem:[%s310_s9] sm:$0xff] %v1910_v47 }
 0x3b9   : > { %v1883_v58 = vadd.f32 1.0, %v2404_v2 }
 0x3ba   : > { %2409 = vrcp.f32 %v1882_v51 }
 0x3bb   : > { %v2406_v42 = vpop.eup %2405  ;;  %2411 = vrcp.f32 %v1883_v58 }
 0x3bc   : > { %v2408_v28 = vpop.eup %2407  ;;  %v1884_v38 = vadd.f32 1.0, %v2406_v42 }
 0x3bd   : > { %v1885_v56 = vadd.f32 1.0, %v2408_v28 }
 0x3be   : > { %2413 = vrcp.f32 %v1884_v38 }
 0x3bf   : > { %2415 = vrcp.f32 %v1885_v56 }
 0x3c4   : > { %v2410_v4 = vpop.eup %2409 }
 0x3c5   : > { %v2412_v13 = vpop.eup %2411 }
 0x3c6   : > { %v1912_v36 = vcombine.low %v2410_v4, %v2412_v13 }
 0x3c8   : > { %v2414_v11 = vpop.eup %2413  ;;  %1920 = vst [vmem:[%s310_s9 + $0x10] sm:$0xff] %v1912_v36 }
 0x3c9   : > { %v2416_v52 = vpop.eup %2415 }
 0x3ca   : > { %v1913_v40 = vcombine.low %v2414_v11, %v2416_v52 }
 0x3cc   : > { %1921 = vst [vmem:[%s310_s9 + $0x18] sm:$0xff] %v1913_v40 }
 0x3cd   : > { %2509 = shalt.err (!%p2506_p3)
}
 0x3ce   : > { %s2510_s23 = scalar_lea.hbm %s3754_s17, 512  ;;  %s2514_s30 = scalar_lea.hbm %s3970_s7, 2048 }
 0x3cf   : > { %p2511_p12 = scmp.ne.s32.totalorder %s3754_s17, %s2510_s23  ;;  %p2515_p6 = scmp.lt.u32.totalorder %s3754_s17, %s3970_s7 }
 0x3d0   : > { %p2516_p4 = scmp.lt.u32.totalorder %s2514_s30, %s2510_s23  ;;  %p2518_p11 = scmp.lt.u32.totalorder %s2510_s23, %s3754_s17 }
 0x3d1   : > { %p2512_p2 = pnand %p2511_p12, %p3971_p0 }
 0x3d2   : > { %p2517_p13 = por %p2516_p4, %p2515_p6 }
 0x3d3   : > { %p2513_p9 = pneg %p2512_p2 }
 0x3d4   : > { %p2519_p8 = por %p2518_p11, %p2517_p13 }
 0x3d6   : > { %p2520_p10 = pnand %p2519_p8, %p2513_p9 }
 0x3d8   : > { %2523 = shalt.err (!%p2520_p10)
}
 0x3d9   : > { %2185 = dma.vmem_to_hbm [thread:$0]  (%p3971_p0), %s3756_s12, 512, %s3754_s17, %s1923_s24  }
 0x3da PF: > { %s3972_s9 = sld [smem:[#allocation14_spill]]  ;;  %s3973_s29 = sld [smem:[#allocation20_spill]] }
 0x3db   : > { %p2205_p5 = scmp.ge.s32.totalorder %s2626_s28, 2 }
 0x3e0   : > { %s1951_s18 = sand.u32 1, %s3972_s9   ;;  %p3974_p7 = scmp.ne.s32.totalorder %s3973_s29, 0 }
 0x3e1   : > { %s1952_s21 = scalar_lea.sflag [#allocation4], %s1951_s18 }
 0x3e2   : > { %p2199_p1 = pnand %p2205_p5, %p3974_p7 }
 0x3e4   : > { %2581 = dma.done.wait (!%p2199_p1), %s1952_s21, 512  }
 0x3e5   : > { %2583 = vsyncadd (!%p2199_p1), %s1952_s21, 4294966784  ;;  %s25_s28 = sadd.s32 1, %s2626_s28   ;;  %s3975_s13 = sld [smem:[#allocation15_spill]] }
 0x3e6   : > { %p22_p3 = scmp.ge.s32.totalorder %s25_s28, 6   ;;  %s3976_s23 = sld [smem:[#allocation18_spill]] }
 0x3e7   : > { %s3977_s24 = sld [smem:[#allocation16_spill]]  ;;  %s3978_s26 = sld [smem:[#allocation17_spill]] }
 0x3e8   : > { %s3979_s0 = sld [smem:[#allocation19_spill]]  ;;  %s3980_s18 = smov %s2590_s19 }
 0x3e9   : > { %s3981_s19 = smov %s2594_s20  ;;  %s3982_s20 = smov %s2858_s6 }
 0x3ea   : > { %s3983_s21 = smov %s2602_s22  ;;  %s3985_s25 = smov %s2622_s27 }
 0x3eb   : > { %s3984_s22 = smov %s3975_s13  ;;  %24 = sbr.rel (!%p22_p3) target bundleno = 16 (0x10), region = 103 }
 0x3ee   : > { %s3986_s27 = smov %s3979_s0 }
 0x3f2   :  { %1957 = vsyncpa [#allocation3], 1 }
 0x3f3   :  { %1959 = vsyncpa [#allocation3 + $0x1], 1 }
 0x3f4   :  { %1960 = vsyncpa [#allocation8], 1 }
 0x3f5   :  { %1962 = vsyncpa [#allocation8 + $0x1], 1 }
 0x3f6   :  { %1963 = vsyncpa [#allocation4], 1 }
 0x3f7   :  { %1965 = vsyncpa [#allocation4 + $0x1], 1 }
 0x3f8   :  { %1966 = vsyncpa [#allocation5], 1 }
 0x3f9   :  { %1968 = vsyncpa [#allocation5 + $0x1], 1 }

</bundles_post_ra>
